<compile_context>
chip_gen: v6e
topology: v6e:2x2x1
jax: 0.10.0
libtpu: 0.0.40
codegen_flags: <defaults>
</compile_context>

<pallas_src>
import functools

import numpy as np

import jax
import jax.numpy as jnp
from jax import lax
from jax.experimental import pallas as pl
from jax.experimental.pallas import tpu as pltpu


# ----------------------------------------------------------------------------
# Host-side helpers
# ----------------------------------------------------------------------------
@functools.lru_cache(maxsize=None)
def _selector_mats(n_neighbor, dim):
    """One-hot selector matrices with the 1/D and 1/N means folded in.

    Flattened lane index k = n*D + d of the (TB, N*D) lane-dense slabs.
      S  (ND, N): mean over d per neighbor            (scale 1/D folded in)
      E  (N, ND): expand p[:, n] to the D lanes of n
      Tt (D, ND): tile the user embedding N times
      T  (ND, D): mean over neighbors per d           (scale 1/N folded in)
    """
    N, D = n_neighbor, dim
    ND = N * D
    k = np.arange(ND)
    S = ((k[:, None] // D) == np.arange(N)[None, :]).astype(np.float32) * (1.0 / D)
    E = (np.arange(N)[:, None] == (k[None, :] // D)).astype(np.float32)
    Tt = (np.arange(D)[:, None] == (k[None, :] % D)).astype(np.float32)
    T = ((k[:, None] % D) == np.arange(D)[None, :]).astype(np.float32) * (1.0 / N)
    return (jnp.asarray(S), jnp.asarray(E), jnp.asarray(Tt), jnp.asarray(T))


def _choose_tb(B, tb_max=2048, target_steps=8):
    """Batch tile: as big as possible (amortize ~0.35us/step) while keeping
    ~target_steps grid steps so v7x's 2 TCs both get several tiles.  Multiple
    of 16 so bf16-packed blocks satisfy the (16, 128) sublane tiling."""
    tb = -(-B // target_steps)            # ceil(B / target_steps)
    tb = max(16, min(tb_max, tb))
    tb = ((tb + 15) // 16) * 16
    return B if tb >= B else tb


# ----------------------------------------------------------------------------
# Shared math core (all f32, lane-dense (TB, N*D) neighbor slabs)
# ----------------------------------------------------------------------------
def _kgcn_core(u, sv, nvf, nrf, y, wt, bias, S, E, Tt, T):
    f32 = jnp.float32
    # user-relation attention: mean over embedding dim (1/D folded into S)
    u_rep = jnp.dot(u, Tt, preferred_element_type=f32)                 # (TB, ND)
    ur = jnp.dot(u_rep * nrf, S, preferred_element_type=f32)           # (TB, N)
    ur = ur - jnp.max(ur, axis=-1, keepdims=True)                      # stable softmax
    e = jnp.exp(ur)
    p = e * pl.reciprocal(jnp.sum(e, axis=-1, keepdims=True), approx=True)

    # neighbor aggregation: mean over the neighbor axis (1/N folded into T)
    p_rep = jnp.dot(p, E, preferred_element_type=f32)                  # (TB, ND)
    neigh_agg = jnp.dot(p_rep * nvf, T, preferred_element_type=f32)    # (TB, D)

    # SumAggregator: tanh(Linear(self + neigh_agg))
    item = jnp.tanh(jnp.dot(sv + neigh_agg, wt, preferred_element_type=f32) + bias)

    # score = sigmoid(<user, item>)  (sigmoid via tanh -> EUP)
    x = jnp.sum(u * item, axis=-1, keepdims=True)                      # (TB, 1) logits
    sig = 0.5 * (jnp.tanh(0.5 * x) + 1.0)
    # numerically stable BCE on logits (== -y*log(sig) - (1-y)*log(1-sig))
    bce = jnp.maximum(x, 0.0) - x * y + jnp.log(1.0 + jnp.exp(-jnp.abs(x)))
    return sig, bce


# ----------------------------------------------------------------------------
# Fused kernel: in-kernel one-hot gather from VMEM-resident tables
# ----------------------------------------------------------------------------
def kgcn_fused_kernel(user_ref, item_idx_ref, ne_ref, nr_ref, lab_ref,
                      ent_ref, rel_ref, wt_ref, b_ref,
                      S_ref, E_ref, Tt_ref, T_ref, out_ref):
    f32 = jnp.float32
    u = user_ref[...].astype(f32)          # (TB, D)   bf16 -> f32 on load
    it = item_idx_ref[...]                 # (TB, 1)   int32
    ne = ne_ref[...]                       # (TB, N)   int32
    nr = nr_ref[...]                       # (TB, N)   int32
    y = lab_ref[...]                       # (TB, 1)
    ent = ent_ref[...].astype(f32)         # (n_ent, D)  resident table
    rel = rel_ref[...].astype(f32)         # (n_rel, D)  resident table
    wt = wt_ref[...]                       # (D, D)
    bias = b_ref[...]                      # (1, D)
    S = S_ref[...]; E = E_ref[...]; Tt = Tt_ref[...]; T = T_ref[...]

    TB, D = u.shape
    N = ne.shape[1]
    n_ent = ent.shape[0]
    n_rel = rel.shape[0]

    ent_lane = lax.broadcasted_iota(jnp.int32, (TB, n_ent), 1)
    rel_lane = lax.broadcasted_iota(jnp.int32, (TB, n_rel), 1)

    # self (item) entity vector: one-hot gather on the MXU
    sv = jnp.dot((it == ent_lane).astype(f32), ent,
                 preferred_element_type=f32)                           # (TB, D)

    # neighbor entity / relation gathers, placed straight into lane-dense
    # (TB, N*D) slabs via per-neighbor placement matmuls (no in-kernel concat).
    nvf = jnp.zeros((TB, N * D), dtype=f32)
    nrf = jnp.zeros((TB, N * D), dtype=f32)
    for n in range(N):                                   # static unroll, N small
        Pn = Tt * E[n:n + 1, :]                          # (D, ND) placement for slot n
        ent_n = jnp.dot((ne[:, n:n + 1] == ent_lane).astype(f32), ent,
                        preferred_element_type=f32)      # (TB, D)
        rel_n = jnp.dot((nr[:, n:n + 1] == rel_lane).astype(f32), rel,
                        preferred_element_type=f32)      # (TB, D)
        nvf = nvf + jnp.dot(ent_n, Pn, preferred_element_type=f32)
        nrf = nrf + jnp.dot(rel_n, Pn, preferred_element_type=f32)

    sig, bce = _kgcn_core(u, sv, nvf, nrf, y, wt, bias, S, E, Tt, T)
    out_ref[:, 0:1] = sig
    out_ref[:, 1:2] = bce


def kgcn_pallas_fused(user_emb, item_idx, ne_idx, nr_idx, labels,
                      entity_emb, relation_emb, w, b, *, n_neighbor, dim,
                      tb_max=2048):
    B, D = user_emb.shape
    N = n_neighbor
    ND = N * D
    TB = _choose_tb(B, tb_max)
    grid = (pl.cdiv(B, TB),)
    S, E, Tt, T = _selector_mats(N, D)

    wt = w.T.astype(jnp.float32)                       # (in, out) for x @ W
    bias = b.reshape(1, D).astype(jnp.float32)
    labels2 = labels.reshape(B, 1).astype(jnp.float32)
    item2 = item_idx.reshape(B, 1).astype(jnp.int32)
    n_ent = entity_emb.shape[0]
    n_rel = relation_emb.shape[0]

    batch = lambda i: (i, 0)
    const = lambda i: (0, 0)
    out = pl.pallas_call(
        kgcn_fused_kernel,
        out_shape=jax.ShapeDtypeStruct((B, 2), jnp.float32),
        grid=grid,
        in_specs=[
            pl.BlockSpec((TB, D), batch),       # user embeddings (bf16)
            pl.BlockSpec((TB, 1), batch),       # item indices
            pl.BlockSpec((TB, N), batch),       # neighbor entity indices
            pl.BlockSpec((TB, N), batch),       # neighbor relation indices
            pl.BlockSpec((TB, 1), batch),       # labels
            pl.BlockSpec((n_ent, D), const),    # entity table   (VMEM resident)
            pl.BlockSpec((n_rel, D), const),    # relation table (VMEM resident)
            pl.BlockSpec((D, D), const),        # agg1 W^T
            pl.BlockSpec((1, D), const),        # agg1 bias
            pl.BlockSpec((ND, N), const),       # S  (1/D folded)
            pl.BlockSpec((N, ND), const),       # E
            pl.BlockSpec((D, ND), const),       # Tt
            pl.BlockSpec((ND, D), const),       # T  (1/N folded)
        ],
        out_specs=pl.BlockSpec((TB, 2), batch),
        compiler_params=pltpu.CompilerParams(
            dimension_semantics=("parallel",),
            vmem_limit_bytes=48 * 1024 * 1024),
    )(user_emb.astype(jnp.bfloat16), item2,
      ne_idx.astype(jnp.int32), nr_idx.astype(jnp.int32), labels2,
      entity_emb, relation_emb, wt, bias, S, E, Tt, T)
    return out[:, 0], out[:, 1]


# ----------------------------------------------------------------------------
# Fallback kernel for large tables: bf16 lane-dense slabs gathered by XLA
# ----------------------------------------------------------------------------
def kgcn_slab_kernel(user_ref, selfv_ref, nvf_ref, nrf_ref, lab_ref,
                     wt_ref, b_ref, S_ref, E_ref, Tt_ref, T_ref, out_ref):
    f32 = jnp.float32
    sig, bce = _kgcn_core(
        user_ref[...].astype(f32), selfv_ref[...].astype(f32),
        nvf_ref[...].astype(f32), nrf_ref[...].astype(f32),
        lab_ref[...], wt_ref[...], b_ref[...],
        S_ref[...], E_ref[...], Tt_ref[...], T_ref[...])
    out_ref[:, 0:1] = sig
    out_ref[:, 1:2] = bce


def kgcn_pallas_slabs(user_emb, self_vec, nvf, nrf, labels, w, b, *,
                      n_neighbor, dim, tb_max=2048):
    B, D = user_emb.shape
    N = n_neighbor
    ND = N * D
    TB = _choose_tb(B, tb_max)
    grid = (pl.cdiv(B, TB),)
    S, E, Tt, T = _selector_mats(N, D)

    wt = w.T.astype(jnp.float32)
    bias = b.reshape(1, D).astype(jnp.float32)
    labels2 = labels.reshape(B, 1).astype(jnp.float32)

    batch = lambda i: (i, 0)
    const = lambda i: (0, 0)
    out = pl.pallas_call(
        kgcn_slab_kernel,
        out_shape=jax.ShapeDtypeStruct((B, 2), jnp.float32),
        grid=grid,
        in_specs=[
            pl.BlockSpec((TB, D), batch),
            pl.BlockSpec((TB, D), batch),
            pl.BlockSpec((TB, ND), batch),
            pl.BlockSpec((TB, ND), batch),
            pl.BlockSpec((TB, 1), batch),
            pl.BlockSpec((D, D), const),
            pl.BlockSpec((1, D), const),
            pl.BlockSpec((ND, N), const),
            pl.BlockSpec((N, ND), const),
            pl.BlockSpec((D, ND), const),
            pl.BlockSpec((ND, D), const),
        ],
        out_specs=pl.BlockSpec((TB, 2), batch),
        compiler_params=pltpu.CompilerParams(
            dimension_semantics=("parallel",),
            vmem_limit_bytes=48 * 1024 * 1024),
    )(user_emb.astype(jnp.bfloat16), self_vec.astype(jnp.bfloat16),
      nvf.astype(jnp.bfloat16), nrf.astype(jnp.bfloat16), labels2, wt, bias,
      S, E, Tt, T)
    return out[:, 0], out[:, 1]


# ----------------------------------------------------------------------------
# Tiled sum-of-squares (Frobenius norm^2) reduction for L2 regularization
# ----------------------------------------------------------------------------
def sumsq_kernel(x_ref, o_ref, acc_ref, *, nrows, tr):
    i = pl.program_id(0)

    @pl.when(i == 0)
    def _init():
        acc_ref[...] = jnp.zeros_like(acc_ref)

    x = x_ref[...].astype(jnp.float32)
    ridx = i * tr + lax.broadcasted_iota(jnp.int32, x.shape, 0)
    x = jnp.where(ridx < nrows, x, 0.0)          # mask partial boundary tile
    acc_ref[...] += jnp.sum(x * x, axis=0, keepdims=True)   # sublane reduce (XLU)

    @pl.when(i == pl.num_programs(0) - 1)
    def _final():
        o_ref[...] = jnp.sum(acc_ref[...], keepdims=True)   # cross-lane reduce once


def sumsq_pallas(x, tr_max=4096):
    R, C = x.shape
    # lane-dense view when the contiguous reshape is free; otherwise keep the
    # original layout (correct, just lane-sparse).
    if (R * C) % 128 == 0:
        x2 = x.reshape((R * C) // 128, 128)
    else:
        x2 = x
    rows, cols = x2.shape
    TR = rows if rows <= tr_max else tr_max      # tr_max is a multiple of 8
    grid = (pl.cdiv(rows, TR),)
    kernel = functools.partial(sumsq_kernel, nrows=rows, tr=TR)
    out = pl.pallas_call(
        kernel,
        out_shape=jax.ShapeDtypeStruct((1, 1), jnp.float32),
        grid=grid,
        in_specs=[pl.BlockSpec((TR, cols), lambda i: (i, 0))],
        out_specs=pl.BlockSpec((1, 1), lambda i: (0, 0)),
        scratch_shapes=[pltpu.VMEM((1, cols), jnp.float32)],
        compiler_params=pltpu.CompilerParams(
            dimension_semantics=("arbitrary",)),
    )(x2)
    return out[0, 0]


# ----------------------------------------------------------------------------
# Full forward (glue in plain JAX: small index gathers, final scalar mean)
# ----------------------------------------------------------------------------
def kgcn_forward(params, adj_entity, adj_relation,
                 user_indices, item_indices, labels, l2_weight=1e-4):
    user_tab = params["user_emb"]
    ent_tab = params["entity_emb"]
    rel_tab = params["relation_emb"]
    w, b = params["agg1_w"], params["agg1_b"]

    B = user_indices.shape[0]
    D = user_tab.shape[1]
    N = adj_entity.shape[1]

    # small gathers left in XLA (few bytes/row): user rows + adjacency indices
    user_emb = user_tab[user_indices]                 # (B, D)
    ne_idx = adj_entity[item_indices]                 # (B, N) int32
    nr_idx = adj_relation[item_indices]               # (B, N) int32

    n_ent, n_rel = ent_tab.shape[0], rel_tab.shape[0]
    if n_ent <= 256 and n_rel <= 256:
        # tables fit comfortably in VMEM -> gather in-kernel (no slab round trip)
        scores, bce = kgcn_pallas_fused(
            user_emb, item_indices, ne_idx, nr_idx, labels,
            ent_tab, rel_tab, w, b, n_neighbor=N, dim=D)
    else:
        # TODO(synk): for large-but-VMEM-resident tables, gather in-kernel via
        # jnp.take / manual DMA instead of the XLA slab gather below.
        self_vec = ent_tab[item_indices]
        nvf = ent_tab[ne_idx].reshape(B, N * D)
        nrf = rel_tab[nr_idx].reshape(B, N * D)
        scores, bce = kgcn_pallas_slabs(
            user_emb, self_vec, nvf, nrf, labels, w, b, n_neighbor=N, dim=D)

    base_loss = jnp.mean(bce)
    l2_loss = (sumsq_pallas(user_tab) + sumsq_pallas(ent_tab)
               + sumsq_pallas(rel_tab)) / 2.0
    loss = base_loss + l2_weight * l2_loss
    return loss, scores


if __name__ == "__main__":
    # small, module-consistent shapes (n_neighbor=8, dim=16 fixed by the spec)
    n_user, n_entity, n_relation = 32, 64, 8
    n_neighbor, dim, batch_size = 8, 16, 8

    key = jax.random.PRNGKey(0)
    ks = jax.random.split(key, 8)

    params = {
        # torch.rand(...) * 2 - 1  ->  uniform(-1, 1)
        "user_emb": jax.random.uniform(ks[0], (n_user, dim),
                                       minval=-1.0, maxval=1.0,
                                       dtype=jnp.float32),
        "entity_emb": jax.random.uniform(ks[1], (n_entity, dim),
                                         minval=-1.0, maxval=1.0,
                                         dtype=jnp.float32),
        "relation_emb": jax.random.uniform(ks[2], (n_relation, dim),
                                           minval=-1.0, maxval=1.0,
                                           dtype=jnp.float32),
        # nn.Linear(dim, dim): weight (out, in), bias (out,)
        "agg1_w": jax.random.uniform(ks[3], (dim, dim),
                                     minval=-0.25, maxval=0.25,
                                     dtype=jnp.float32),
        "agg1_b": jax.random.uniform(ks[4], (dim,),
                                     minval=-0.25, maxval=0.25,
                                     dtype=jnp.float32),
    }

    adj_entity = jax.random.randint(ks[5], (n_entity, n_neighbor), 0, n_entity,
                                    dtype=jnp.int32)
    adj_relation = jax.random.randint(ks[6], (n_entity, n_neighbor), 0,
                                      n_relation, dtype=jnp.int32)

    user_indices = jax.random.randint(ks[7], (batch_size,), 0, n_user,
                                      dtype=jnp.int32)
    item_indices = jax.random.randint(jax.random.fold_in(key, 99),
                                      (batch_size,), 0, n_entity,
                                      dtype=jnp.int32)
    labels = (jax.random.uniform(jax.random.fold_in(key, 7),
                                 (batch_size,)) > 0.5).astype(jnp.float32)

    loss, scores = kgcn_forward(params, adj_entity, adj_relation,
                                user_indices, item_indices, labels)
    jax.block_until_ready(loss)
    jax.block_until_ready(scores)
    print("KERNEL_OK")
</pallas_src>

<mosaic_0001>
module attributes {stable_mosaic.version = 11 : i64} {
  func.func @kgcn_fused_kernel(%arg0: i32, %arg1: memref<8x16xbf16, #tpu.memory_space<vmem>>, %arg2: memref<8x1xi32, #tpu.memory_space<vmem>>, %arg3: memref<8x8xi32, #tpu.memory_space<vmem>>, %arg4: memref<8x8xi32, #tpu.memory_space<vmem>>, %arg5: memref<8x1xf32, #tpu.memory_space<vmem>>, %arg6: memref<64x16xf32, #tpu.memory_space<vmem>>, %arg7: memref<8x16xf32, #tpu.memory_space<vmem>>, %arg8: memref<16x16xf32, #tpu.memory_space<vmem>>, %arg9: memref<1x16xf32, #tpu.memory_space<vmem>>, %arg10: memref<128x8xf32, #tpu.memory_space<vmem>>, %arg11: memref<8x128xf32, #tpu.memory_space<vmem>>, %arg12: memref<16x128xf32, #tpu.memory_space<vmem>>, %arg13: memref<128x16xf32, #tpu.memory_space<vmem>>, %arg14: memref<8x2xf32, #tpu.memory_space<vmem>>) attributes {dimension_semantics = [#tpu.dimension_semantics<parallel>], iteration_bounds = array<i64: 1>, scalar_prefetch = 0 : i64, scratch_operands = 0 : i64, tpu.core_type = #tpu.core_type<tc>, window_params = [{transform_indices = @transform_0, window_bounds = array<i64: 8, 16>}, {transform_indices = @transform_1, window_bounds = array<i64: 8, 1>}, {transform_indices = @transform_2, window_bounds = array<i64: 8, 8>}, {transform_indices = @transform_3, window_bounds = array<i64: 8, 8>}, {transform_indices = @transform_4, window_bounds = array<i64: 8, 1>}, {pipeline_mode = #tpu.pipeline_mode<synchronous>, transform_indices = @transform_5, window_bounds = array<i64: 64, 16>}, {pipeline_mode = #tpu.pipeline_mode<synchronous>, transform_indices = @transform_6, window_bounds = array<i64: 8, 16>}, {pipeline_mode = #tpu.pipeline_mode<synchronous>, transform_indices = @transform_7, window_bounds = array<i64: 16, 16>}, {pipeline_mode = #tpu.pipeline_mode<synchronous>, transform_indices = @transform_8, window_bounds = array<i64: 1, 16>}, {pipeline_mode = #tpu.pipeline_mode<synchronous>, transform_indices = @transform_9, window_bounds = array<i64: 128, 8>}, {pipeline_mode = #tpu.pipeline_mode<synchronous>, transform_indices = @transform_10, window_bounds = array<i64: 8, 128>}, {pipeline_mode = #tpu.pipeline_mode<synchronous>, transform_indices = @transform_11, window_bounds = array<i64: 16, 128>}, {pipeline_mode = #tpu.pipeline_mode<synchronous>, transform_indices = @transform_12, window_bounds = array<i64: 128, 16>}, {transform_indices = @transform_13, window_bounds = array<i64: 8, 2>}]} {
    %c0 = arith.constant 0 : index
    %c0_0 = arith.constant 0 : index
    %0 = vector.load %arg1[%c0, %c0_0] : memref<8x16xbf16, #tpu.memory_space<vmem>>, vector<8x16xbf16>
    %1 = arith.extf %0 : vector<8x16xbf16> to vector<8x16xf32>
    %c0_1 = arith.constant 0 : index
    %c0_2 = arith.constant 0 : index
    %2 = vector.load %arg2[%c0_1, %c0_2] : memref<8x1xi32, #tpu.memory_space<vmem>>, vector<8x1xi32>
    %c0_3 = arith.constant 0 : index
    %c0_4 = arith.constant 0 : index
    %3 = vector.load %arg3[%c0_3, %c0_4] : memref<8x8xi32, #tpu.memory_space<vmem>>, vector<8x8xi32>
    %c0_5 = arith.constant 0 : index
    %c0_6 = arith.constant 0 : index
    %4 = vector.load %arg4[%c0_5, %c0_6] : memref<8x8xi32, #tpu.memory_space<vmem>>, vector<8x8xi32>
    %c0_7 = arith.constant 0 : index
    %c0_8 = arith.constant 0 : index
    %5 = vector.load %arg5[%c0_7, %c0_8] : memref<8x1xf32, #tpu.memory_space<vmem>>, vector<8x1xf32>
    %c0_9 = arith.constant 0 : index
    %c0_10 = arith.constant 0 : index
    %6 = vector.load %arg6[%c0_9, %c0_10] : memref<64x16xf32, #tpu.memory_space<vmem>>, vector<64x16xf32>
    %c0_11 = arith.constant 0 : index
    %c0_12 = arith.constant 0 : index
    %7 = vector.load %arg7[%c0_11, %c0_12] : memref<8x16xf32, #tpu.memory_space<vmem>>, vector<8x16xf32>
    %c0_13 = arith.constant 0 : index
    %c0_14 = arith.constant 0 : index
    %8 = vector.load %arg8[%c0_13, %c0_14] : memref<16x16xf32, #tpu.memory_space<vmem>>, vector<16x16xf32>
    %c0_15 = arith.constant 0 : index
    %c0_16 = arith.constant 0 : index
    %9 = vector.load %arg9[%c0_15, %c0_16] : memref<1x16xf32, #tpu.memory_space<vmem>>, vector<1x16xf32>
    %c0_17 = arith.constant 0 : index
    %c0_18 = arith.constant 0 : index
    %10 = vector.load %arg10[%c0_17, %c0_18] : memref<128x8xf32, #tpu.memory_space<vmem>>, vector<128x8xf32>
    %c0_19 = arith.constant 0 : index
    %c0_20 = arith.constant 0 : index
    %11 = vector.load %arg11[%c0_19, %c0_20] : memref<8x128xf32, #tpu.memory_space<vmem>>, vector<8x128xf32>
    %c0_21 = arith.constant 0 : index
    %c0_22 = arith.constant 0 : index
    %12 = vector.load %arg12[%c0_21, %c0_22] : memref<16x128xf32, #tpu.memory_space<vmem>>, vector<16x128xf32>
    %c0_23 = arith.constant 0 : index
    %c0_24 = arith.constant 0 : index
    %13 = vector.load %arg13[%c0_23, %c0_24] : memref<128x16xf32, #tpu.memory_space<vmem>>, vector<128x16xf32>
    %14 = tpu.iota {dimensions = array<i32: 1>} : vector<8x64xi32>
    %15 = tpu.iota {dimensions = array<i32: 1>} : vector<8x8xi32>
    %16 = vector.broadcast %2 : vector<8x1xi32> to vector<8x64xi32>
    %17 = arith.cmpi eq, %16, %14 : vector<8x64xi32>
    %18 = arith.extui %17 : vector<8x64xi1> to vector<8x64xi32>
    %19 = arith.sitofp %18 : vector<8x64xi32> to vector<8x64xf32>
    %cst = arith.constant dense<0.000000e+00> : vector<8x16xf32>
    %20 = tpu.matmul %19, %6, %cst {dimension_numbers = #tpu.dot_dimension_numbers<[1], [0], [0], [1], [0, 0, 1, 1], [], []>} : vector<8x64xf32>, vector<64x16xf32>, vector<8x16xf32> -> vector<8x16xf32>
    %cst_25 = arith.constant 0.000000e+00 : f32
    %21 = vector.broadcast %cst_25 : f32 to vector<8x128xf32>
    %cst_26 = arith.constant 0.000000e+00 : f32
    %22 = vector.broadcast %cst_26 : f32 to vector<8x128xf32>
    %23 = vector.extract_strided_slice %11 {offsets = [0, 0], sizes = [1, 128], strides = [1, 1]} : vector<8x128xf32> to vector<1x128xf32>
    %24 = vector.broadcast %23 : vector<1x128xf32> to vector<16x128xf32>
    %25 = arith.mulf %12, %24 : vector<16x128xf32>
    %26 = vector.extract_strided_slice %3 {offsets = [0, 0], sizes = [8, 1], strides = [1, 1]} : vector<8x8xi32> to vector<8x1xi32>
    %27 = vector.broadcast %26 : vector<8x1xi32> to vector<8x64xi32>
    %28 = arith.cmpi eq, %27, %14 : vector<8x64xi32>
    %29 = arith.extui %28 : vector<8x64xi1> to vector<8x64xi32>
    %30 = arith.sitofp %29 : vector<8x64xi32> to vector<8x64xf32>
    %cst_27 = arith.constant dense<0.000000e+00> : vector<8x16xf32>
    %31 = tpu.matmul %30, %6, %cst_27 {dimension_numbers = #tpu.dot_dimension_numbers<[1], [0], [0], [1], [0, 0, 1, 1], [], []>} : vector<8x64xf32>, vector<64x16xf32>, vector<8x16xf32> -> vector<8x16xf32>
    %32 = vector.extract_strided_slice %4 {offsets = [0, 0], sizes = [8, 1], strides = [1, 1]} : vector<8x8xi32> to vector<8x1xi32>
    %33 = vector.broadcast %32 : vector<8x1xi32> to vector<8x8xi32>
    %34 = arith.cmpi eq, %33, %15 : vector<8x8xi32>
    %35 = arith.extui %34 : vector<8x8xi1> to vector<8x8xi32>
    %36 = arith.sitofp %35 : vector<8x8xi32> to vector<8x8xf32>
    %cst_28 = arith.constant dense<0.000000e+00> : vector<8x16xf32>
    %37 = tpu.matmul %36, %7, %cst_28 {dimension_numbers = #tpu.dot_dimension_numbers<[1], [0], [0], [1], [0, 0, 1, 1], [], []>} : vector<8x8xf32>, vector<8x16xf32>, vector<8x16xf32> -> vector<8x16xf32>
    %cst_29 = arith.constant dense<0.000000e+00> : vector<8x128xf32>
    %38 = tpu.matmul %31, %25, %cst_29 {dimension_numbers = #tpu.dot_dimension_numbers<[1], [0], [0], [1], [0, 0, 1, 1], [], []>} : vector<8x16xf32>, vector<16x128xf32>, vector<8x128xf32> -> vector<8x128xf32>
    %39 = arith.addf %21, %38 : vector<8x128xf32>
    %cst_30 = arith.constant dense<0.000000e+00> : vector<8x128xf32>
    %40 = tpu.matmul %37, %25, %cst_30 {dimension_numbers = #tpu.dot_dimension_numbers<[1], [0], [0], [1], [0, 0, 1, 1], [], []>} : vector<8x16xf32>, vector<16x128xf32>, vector<8x128xf32> -> vector<8x128xf32>
    %41 = arith.addf %22, %40 : vector<8x128xf32>
    %42 = vector.extract_strided_slice %11 {offsets = [1, 0], sizes = [1, 128], strides = [1, 1]} : vector<8x128xf32> to vector<1x128xf32>
    %43 = vector.broadcast %42 : vector<1x128xf32> to vector<16x128xf32>
    %44 = arith.mulf %12, %43 : vector<16x128xf32>
    %45 = vector.extract_strided_slice %3 {offsets = [0, 1], sizes = [8, 1], strides = [1, 1]} : vector<8x8xi32> to vector<8x1xi32>
    %46 = vector.broadcast %45 : vector<8x1xi32> to vector<8x64xi32>
    %47 = arith.cmpi eq, %46, %14 : vector<8x64xi32>
    %48 = arith.extui %47 : vector<8x64xi1> to vector<8x64xi32>
    %49 = arith.sitofp %48 : vector<8x64xi32> to vector<8x64xf32>
    %cst_31 = arith.constant dense<0.000000e+00> : vector<8x16xf32>
    %50 = tpu.matmul %49, %6, %cst_31 {dimension_numbers = #tpu.dot_dimension_numbers<[1], [0], [0], [1], [0, 0, 1, 1], [], []>} : vector<8x64xf32>, vector<64x16xf32>, vector<8x16xf32> -> vector<8x16xf32>
    %51 = vector.extract_strided_slice %4 {offsets = [0, 1], sizes = [8, 1], strides = [1, 1]} : vector<8x8xi32> to vector<8x1xi32>
    %52 = vector.broadcast %51 : vector<8x1xi32> to vector<8x8xi32>
    %53 = arith.cmpi eq, %52, %15 : vector<8x8xi32>
    %54 = arith.extui %53 : vector<8x8xi1> to vector<8x8xi32>
    %55 = arith.sitofp %54 : vector<8x8xi32> to vector<8x8xf32>
    %cst_32 = arith.constant dense<0.000000e+00> : vector<8x16xf32>
    %56 = tpu.matmul %55, %7, %cst_32 {dimension_numbers = #tpu.dot_dimension_numbers<[1], [0], [0], [1], [0, 0, 1, 1], [], []>} : vector<8x8xf32>, vector<8x16xf32>, vector<8x16xf32> -> vector<8x16xf32>
    %cst_33 = arith.constant dense<0.000000e+00> : vector<8x128xf32>
    %57 = tpu.matmul %50, %44, %cst_33 {dimension_numbers = #tpu.dot_dimension_numbers<[1], [0], [0], [1], [0, 0, 1, 1], [], []>} : vector<8x16xf32>, vector<16x128xf32>, vector<8x128xf32> -> vector<8x128xf32>
    %58 = arith.addf %39, %57 : vector<8x128xf32>
    %cst_34 = arith.constant dense<0.000000e+00> : vector<8x128xf32>
    %59 = tpu.matmul %56, %44, %cst_34 {dimension_numbers = #tpu.dot_dimension_numbers<[1], [0], [0], [1], [0, 0, 1, 1], [], []>} : vector<8x16xf32>, vector<16x128xf32>, vector<8x128xf32> -> vector<8x128xf32>
    %60 = arith.addf %41, %59 : vector<8x128xf32>
    %61 = vector.extract_strided_slice %11 {offsets = [2, 0], sizes = [1, 128], strides = [1, 1]} : vector<8x128xf32> to vector<1x128xf32>
    %62 = vector.broadcast %61 : vector<1x128xf32> to vector<16x128xf32>
    %63 = arith.mulf %12, %62 : vector<16x128xf32>
    %64 = vector.extract_strided_slice %3 {offsets = [0, 2], sizes = [8, 1], strides = [1, 1]} : vector<8x8xi32> to vector<8x1xi32>
    %65 = vector.broadcast %64 : vector<8x1xi32> to vector<8x64xi32>
    %66 = arith.cmpi eq, %65, %14 : vector<8x64xi32>
    %67 = arith.extui %66 : vector<8x64xi1> to vector<8x64xi32>
    %68 = arith.sitofp %67 : vector<8x64xi32> to vector<8x64xf32>
    %cst_35 = arith.constant dense<0.000000e+00> : vector<8x16xf32>
    %69 = tpu.matmul %68, %6, %cst_35 {dimension_numbers = #tpu.dot_dimension_numbers<[1], [0], [0], [1], [0, 0, 1, 1], [], []>} : vector<8x64xf32>, vector<64x16xf32>, vector<8x16xf32> -> vector<8x16xf32>
    %70 = vector.extract_strided_slice %4 {offsets = [0, 2], sizes = [8, 1], strides = [1, 1]} : vector<8x8xi32> to vector<8x1xi32>
    %71 = vector.broadcast %70 : vector<8x1xi32> to vector<8x8xi32>
    %72 = arith.cmpi eq, %71, %15 : vector<8x8xi32>
    %73 = arith.extui %72 : vector<8x8xi1> to vector<8x8xi32>
    %74 = arith.sitofp %73 : vector<8x8xi32> to vector<8x8xf32>
    %cst_36 = arith.constant dense<0.000000e+00> : vector<8x16xf32>
    %75 = tpu.matmul %74, %7, %cst_36 {dimension_numbers = #tpu.dot_dimension_numbers<[1], [0], [0], [1], [0, 0, 1, 1], [], []>} : vector<8x8xf32>, vector<8x16xf32>, vector<8x16xf32> -> vector<8x16xf32>
    %cst_37 = arith.constant dense<0.000000e+00> : vector<8x128xf32>
    %76 = tpu.matmul %69, %63, %cst_37 {dimension_numbers = #tpu.dot_dimension_numbers<[1], [0], [0], [1], [0, 0, 1, 1], [], []>} : vector<8x16xf32>, vector<16x128xf32>, vector<8x128xf32> -> vector<8x128xf32>
    %77 = arith.addf %58, %76 : vector<8x128xf32>
    %cst_38 = arith.constant dense<0.000000e+00> : vector<8x128xf32>
    %78 = tpu.matmul %75, %63, %cst_38 {dimension_numbers = #tpu.dot_dimension_numbers<[1], [0], [0], [1], [0, 0, 1, 1], [], []>} : vector<8x16xf32>, vector<16x128xf32>, vector<8x128xf32> -> vector<8x128xf32>
    %79 = arith.addf %60, %78 : vector<8x128xf32>
    %80 = vector.extract_strided_slice %11 {offsets = [3, 0], sizes = [1, 128], strides = [1, 1]} : vector<8x128xf32> to vector<1x128xf32>
    %81 = vector.broadcast %80 : vector<1x128xf32> to vector<16x128xf32>
    %82 = arith.mulf %12, %81 : vector<16x128xf32>
    %83 = vector.extract_strided_slice %3 {offsets = [0, 3], sizes = [8, 1], strides = [1, 1]} : vector<8x8xi32> to vector<8x1xi32>
    %84 = vector.broadcast %83 : vector<8x1xi32> to vector<8x64xi32>
    %85 = arith.cmpi eq, %84, %14 : vector<8x64xi32>
    %86 = arith.extui %85 : vector<8x64xi1> to vector<8x64xi32>
    %87 = arith.sitofp %86 : vector<8x64xi32> to vector<8x64xf32>
    %cst_39 = arith.constant dense<0.000000e+00> : vector<8x16xf32>
    %88 = tpu.matmul %87, %6, %cst_39 {dimension_numbers = #tpu.dot_dimension_numbers<[1], [0], [0], [1], [0, 0, 1, 1], [], []>} : vector<8x64xf32>, vector<64x16xf32>, vector<8x16xf32> -> vector<8x16xf32>
    %89 = vector.extract_strided_slice %4 {offsets = [0, 3], sizes = [8, 1], strides = [1, 1]} : vector<8x8xi32> to vector<8x1xi32>
    %90 = vector.broadcast %89 : vector<8x1xi32> to vector<8x8xi32>
    %91 = arith.cmpi eq, %90, %15 : vector<8x8xi32>
    %92 = arith.extui %91 : vector<8x8xi1> to vector<8x8xi32>
    %93 = arith.sitofp %92 : vector<8x8xi32> to vector<8x8xf32>
    %cst_40 = arith.constant dense<0.000000e+00> : vector<8x16xf32>
    %94 = tpu.matmul %93, %7, %cst_40 {dimension_numbers = #tpu.dot_dimension_numbers<[1], [0], [0], [1], [0, 0, 1, 1], [], []>} : vector<8x8xf32>, vector<8x16xf32>, vector<8x16xf32> -> vector<8x16xf32>
    %cst_41 = arith.constant dense<0.000000e+00> : vector<8x128xf32>
    %95 = tpu.matmul %88, %82, %cst_41 {dimension_numbers = #tpu.dot_dimension_numbers<[1], [0], [0], [1], [0, 0, 1, 1], [], []>} : vector<8x16xf32>, vector<16x128xf32>, vector<8x128xf32> -> vector<8x128xf32>
    %96 = arith.addf %77, %95 : vector<8x128xf32>
    %cst_42 = arith.constant dense<0.000000e+00> : vector<8x128xf32>
    %97 = tpu.matmul %94, %82, %cst_42 {dimension_numbers = #tpu.dot_dimension_numbers<[1], [0], [0], [1], [0, 0, 1, 1], [], []>} : vector<8x16xf32>, vector<16x128xf32>, vector<8x128xf32> -> vector<8x128xf32>
    %98 = arith.addf %79, %97 : vector<8x128xf32>
    %99 = vector.extract_strided_slice %11 {offsets = [4, 0], sizes = [1, 128], strides = [1, 1]} : vector<8x128xf32> to vector<1x128xf32>
    %100 = vector.broadcast %99 : vector<1x128xf32> to vector<16x128xf32>
    %101 = arith.mulf %12, %100 : vector<16x128xf32>
    %102 = vector.extract_strided_slice %3 {offsets = [0, 4], sizes = [8, 1], strides = [1, 1]} : vector<8x8xi32> to vector<8x1xi32>
    %103 = vector.broadcast %102 : vector<8x1xi32> to vector<8x64xi32>
    %104 = arith.cmpi eq, %103, %14 : vector<8x64xi32>
    %105 = arith.extui %104 : vector<8x64xi1> to vector<8x64xi32>
    %106 = arith.sitofp %105 : vector<8x64xi32> to vector<8x64xf32>
    %cst_43 = arith.constant dense<0.000000e+00> : vector<8x16xf32>
    %107 = tpu.matmul %106, %6, %cst_43 {dimension_numbers = #tpu.dot_dimension_numbers<[1], [0], [0], [1], [0, 0, 1, 1], [], []>} : vector<8x64xf32>, vector<64x16xf32>, vector<8x16xf32> -> vector<8x16xf32>
    %108 = vector.extract_strided_slice %4 {offsets = [0, 4], sizes = [8, 1], strides = [1, 1]} : vector<8x8xi32> to vector<8x1xi32>
    %109 = vector.broadcast %108 : vector<8x1xi32> to vector<8x8xi32>
    %110 = arith.cmpi eq, %109, %15 : vector<8x8xi32>
    %111 = arith.extui %110 : vector<8x8xi1> to vector<8x8xi32>
    %112 = arith.sitofp %111 : vector<8x8xi32> to vector<8x8xf32>
    %cst_44 = arith.constant dense<0.000000e+00> : vector<8x16xf32>
    %113 = tpu.matmul %112, %7, %cst_44 {dimension_numbers = #tpu.dot_dimension_numbers<[1], [0], [0], [1], [0, 0, 1, 1], [], []>} : vector<8x8xf32>, vector<8x16xf32>, vector<8x16xf32> -> vector<8x16xf32>
    %cst_45 = arith.constant dense<0.000000e+00> : vector<8x128xf32>
    %114 = tpu.matmul %107, %101, %cst_45 {dimension_numbers = #tpu.dot_dimension_numbers<[1], [0], [0], [1], [0, 0, 1, 1], [], []>} : vector<8x16xf32>, vector<16x128xf32>, vector<8x128xf32> -> vector<8x128xf32>
    %115 = arith.addf %96, %114 : vector<8x128xf32>
    %cst_46 = arith.constant dense<0.000000e+00> : vector<8x128xf32>
    %116 = tpu.matmul %113, %101, %cst_46 {dimension_numbers = #tpu.dot_dimension_numbers<[1], [0], [0], [1], [0, 0, 1, 1], [], []>} : vector<8x16xf32>, vector<16x128xf32>, vector<8x128xf32> -> vector<8x128xf32>
    %117 = arith.addf %98, %116 : vector<8x128xf32>
    %118 = vector.extract_strided_slice %11 {offsets = [5, 0], sizes = [1, 128], strides = [1, 1]} : vector<8x128xf32> to vector<1x128xf32>
    %119 = vector.broadcast %118 : vector<1x128xf32> to vector<16x128xf32>
    %120 = arith.mulf %12, %119 : vector<16x128xf32>
    %121 = vector.extract_strided_slice %3 {offsets = [0, 5], sizes = [8, 1], strides = [1, 1]} : vector<8x8xi32> to vector<8x1xi32>
    %122 = vector.broadcast %121 : vector<8x1xi32> to vector<8x64xi32>
    %123 = arith.cmpi eq, %122, %14 : vector<8x64xi32>
    %124 = arith.extui %123 : vector<8x64xi1> to vector<8x64xi32>
    %125 = arith.sitofp %124 : vector<8x64xi32> to vector<8x64xf32>
    %cst_47 = arith.constant dense<0.000000e+00> : vector<8x16xf32>
    %126 = tpu.matmul %125, %6, %cst_47 {dimension_numbers = #tpu.dot_dimension_numbers<[1], [0], [0], [1], [0, 0, 1, 1], [], []>} : vector<8x64xf32>, vector<64x16xf32>, vector<8x16xf32> -> vector<8x16xf32>
    %127 = vector.extract_strided_slice %4 {offsets = [0, 5], sizes = [8, 1], strides = [1, 1]} : vector<8x8xi32> to vector<8x1xi32>
    %128 = vector.broadcast %127 : vector<8x1xi32> to vector<8x8xi32>
    %129 = arith.cmpi eq, %128, %15 : vector<8x8xi32>
    %130 = arith.extui %129 : vector<8x8xi1> to vector<8x8xi32>
    %131 = arith.sitofp %130 : vector<8x8xi32> to vector<8x8xf32>
    %cst_48 = arith.constant dense<0.000000e+00> : vector<8x16xf32>
    %132 = tpu.matmul %131, %7, %cst_48 {dimension_numbers = #tpu.dot_dimension_numbers<[1], [0], [0], [1], [0, 0, 1, 1], [], []>} : vector<8x8xf32>, vector<8x16xf32>, vector<8x16xf32> -> vector<8x16xf32>
    %cst_49 = arith.constant dense<0.000000e+00> : vector<8x128xf32>
    %133 = tpu.matmul %126, %120, %cst_49 {dimension_numbers = #tpu.dot_dimension_numbers<[1], [0], [0], [1], [0, 0, 1, 1], [], []>} : vector<8x16xf32>, vector<16x128xf32>, vector<8x128xf32> -> vector<8x128xf32>
    %134 = arith.addf %115, %133 : vector<8x128xf32>
    %cst_50 = arith.constant dense<0.000000e+00> : vector<8x128xf32>
    %135 = tpu.matmul %132, %120, %cst_50 {dimension_numbers = #tpu.dot_dimension_numbers<[1], [0], [0], [1], [0, 0, 1, 1], [], []>} : vector<8x16xf32>, vector<16x128xf32>, vector<8x128xf32> -> vector<8x128xf32>
    %136 = arith.addf %117, %135 : vector<8x128xf32>
    %137 = vector.extract_strided_slice %11 {offsets = [6, 0], sizes = [1, 128], strides = [1, 1]} : vector<8x128xf32> to vector<1x128xf32>
    %138 = vector.broadcast %137 : vector<1x128xf32> to vector<16x128xf32>
    %139 = arith.mulf %12, %138 : vector<16x128xf32>
    %140 = vector.extract_strided_slice %3 {offsets = [0, 6], sizes = [8, 1], strides = [1, 1]} : vector<8x8xi32> to vector<8x1xi32>
    %141 = vector.broadcast %140 : vector<8x1xi32> to vector<8x64xi32>
    %142 = arith.cmpi eq, %141, %14 : vector<8x64xi32>
    %143 = arith.extui %142 : vector<8x64xi1> to vector<8x64xi32>
    %144 = arith.sitofp %143 : vector<8x64xi32> to vector<8x64xf32>
    %cst_51 = arith.constant dense<0.000000e+00> : vector<8x16xf32>
    %145 = tpu.matmul %144, %6, %cst_51 {dimension_numbers = #tpu.dot_dimension_numbers<[1], [0], [0], [1], [0, 0, 1, 1], [], []>} : vector<8x64xf32>, vector<64x16xf32>, vector<8x16xf32> -> vector<8x16xf32>
    %146 = vector.extract_strided_slice %4 {offsets = [0, 6], sizes = [8, 1], strides = [1, 1]} : vector<8x8xi32> to vector<8x1xi32>
    %147 = vector.broadcast %146 : vector<8x1xi32> to vector<8x8xi32>
    %148 = arith.cmpi eq, %147, %15 : vector<8x8xi32>
    %149 = arith.extui %148 : vector<8x8xi1> to vector<8x8xi32>
    %150 = arith.sitofp %149 : vector<8x8xi32> to vector<8x8xf32>
    %cst_52 = arith.constant dense<0.000000e+00> : vector<8x16xf32>
    %151 = tpu.matmul %150, %7, %cst_52 {dimension_numbers = #tpu.dot_dimension_numbers<[1], [0], [0], [1], [0, 0, 1, 1], [], []>} : vector<8x8xf32>, vector<8x16xf32>, vector<8x16xf32> -> vector<8x16xf32>
    %cst_53 = arith.constant dense<0.000000e+00> : vector<8x128xf32>
    %152 = tpu.matmul %145, %139, %cst_53 {dimension_numbers = #tpu.dot_dimension_numbers<[1], [0], [0], [1], [0, 0, 1, 1], [], []>} : vector<8x16xf32>, vector<16x128xf32>, vector<8x128xf32> -> vector<8x128xf32>
    %153 = arith.addf %134, %152 : vector<8x128xf32>
    %cst_54 = arith.constant dense<0.000000e+00> : vector<8x128xf32>
    %154 = tpu.matmul %151, %139, %cst_54 {dimension_numbers = #tpu.dot_dimension_numbers<[1], [0], [0], [1], [0, 0, 1, 1], [], []>} : vector<8x16xf32>, vector<16x128xf32>, vector<8x128xf32> -> vector<8x128xf32>
    %155 = arith.addf %136, %154 : vector<8x128xf32>
    %156 = vector.extract_strided_slice %11 {offsets = [7, 0], sizes = [1, 128], strides = [1, 1]} : vector<8x128xf32> to vector<1x128xf32>
    %157 = vector.broadcast %156 : vector<1x128xf32> to vector<16x128xf32>
    %158 = arith.mulf %12, %157 : vector<16x128xf32>
    %159 = vector.extract_strided_slice %3 {offsets = [0, 7], sizes = [8, 1], strides = [1, 1]} : vector<8x8xi32> to vector<8x1xi32>
    %160 = vector.broadcast %159 : vector<8x1xi32> to vector<8x64xi32>
    %161 = arith.cmpi eq, %160, %14 : vector<8x64xi32>
    %162 = arith.extui %161 : vector<8x64xi1> to vector<8x64xi32>
    %163 = arith.sitofp %162 : vector<8x64xi32> to vector<8x64xf32>
    %cst_55 = arith.constant dense<0.000000e+00> : vector<8x16xf32>
    %164 = tpu.matmul %163, %6, %cst_55 {dimension_numbers = #tpu.dot_dimension_numbers<[1], [0], [0], [1], [0, 0, 1, 1], [], []>} : vector<8x64xf32>, vector<64x16xf32>, vector<8x16xf32> -> vector<8x16xf32>
    %165 = vector.extract_strided_slice %4 {offsets = [0, 7], sizes = [8, 1], strides = [1, 1]} : vector<8x8xi32> to vector<8x1xi32>
    %166 = vector.broadcast %165 : vector<8x1xi32> to vector<8x8xi32>
    %167 = arith.cmpi eq, %166, %15 : vector<8x8xi32>
    %168 = arith.extui %167 : vector<8x8xi1> to vector<8x8xi32>
    %169 = arith.sitofp %168 : vector<8x8xi32> to vector<8x8xf32>
    %cst_56 = arith.constant dense<0.000000e+00> : vector<8x16xf32>
    %170 = tpu.matmul %169, %7, %cst_56 {dimension_numbers = #tpu.dot_dimension_numbers<[1], [0], [0], [1], [0, 0, 1, 1], [], []>} : vector<8x8xf32>, vector<8x16xf32>, vector<8x16xf32> -> vector<8x16xf32>
    %cst_57 = arith.constant dense<0.000000e+00> : vector<8x128xf32>
    %171 = tpu.matmul %164, %158, %cst_57 {dimension_numbers = #tpu.dot_dimension_numbers<[1], [0], [0], [1], [0, 0, 1, 1], [], []>} : vector<8x16xf32>, vector<16x128xf32>, vector<8x128xf32> -> vector<8x128xf32>
    %172 = arith.addf %153, %171 : vector<8x128xf32>
    %cst_58 = arith.constant dense<0.000000e+00> : vector<8x128xf32>
    %173 = tpu.matmul %170, %158, %cst_58 {dimension_numbers = #tpu.dot_dimension_numbers<[1], [0], [0], [1], [0, 0, 1, 1], [], []>} : vector<8x16xf32>, vector<16x128xf32>, vector<8x128xf32> -> vector<8x128xf32>
    %174 = arith.addf %155, %173 : vector<8x128xf32>
    %cst_59 = arith.constant dense<0.000000e+00> : vector<8x128xf32>
    %175 = tpu.matmul %1, %12, %cst_59 {dimension_numbers = #tpu.dot_dimension_numbers<[1], [0], [0], [1], [0, 0, 1, 1], [], []>} : vector<8x16xf32>, vector<16x128xf32>, vector<8x128xf32> -> vector<8x128xf32>
    %176 = arith.mulf %175, %174 : vector<8x128xf32>
    %cst_60 = arith.constant dense<0.000000e+00> : vector<8x8xf32>
    %177 = tpu.matmul %176, %10, %cst_60 {dimension_numbers = #tpu.dot_dimension_numbers<[1], [0], [0], [1], [0, 0, 1, 1], [], []>} : vector<8x128xf32>, vector<128x8xf32>, vector<8x8xf32> -> vector<8x8xf32>
    %cst_61 = arith.constant dense<0xFF800000> : vector<8xf32>
    %178 = vector.multi_reduction <maximumf>, %177, %cst_61 [1] : vector<8x8xf32> to vector<8xf32>
    %179 = vector.shape_cast %178 : vector<8xf32> to vector<8x1xf32>
    %180 = vector.broadcast %179 : vector<8x1xf32> to vector<8x8xf32>
    %181 = arith.subf %177, %180 : vector<8x8xf32>
    %182 = math.exp %181 : vector<8x8xf32>
    %cst_62 = arith.constant dense<0.000000e+00> : vector<8xf32>
    %183 = vector.multi_reduction <add>, %182, %cst_62 [1] : vector<8x8xf32> to vector<8xf32>
    %184 = vector.shape_cast %183 : vector<8xf32> to vector<8x1xf32>
    %185 = tpu.reciprocal %184 {approx = true} : vector<8x1xf32> -> vector<8x1xf32>
    %186 = vector.broadcast %185 : vector<8x1xf32> to vector<8x8xf32>
    %187 = arith.mulf %182, %186 : vector<8x8xf32>
    %cst_63 = arith.constant dense<0.000000e+00> : vector<8x128xf32>
    %188 = tpu.matmul %187, %11, %cst_63 {dimension_numbers = #tpu.dot_dimension_numbers<[1], [0], [0], [1], [0, 0, 1, 1], [], []>} : vector<8x8xf32>, vector<8x128xf32>, vector<8x128xf32> -> vector<8x128xf32>
    %189 = arith.mulf %188, %172 : vector<8x128xf32>
    %cst_64 = arith.constant dense<0.000000e+00> : vector<8x16xf32>
    %190 = tpu.matmul %189, %13, %cst_64 {dimension_numbers = #tpu.dot_dimension_numbers<[1], [0], [0], [1], [0, 0, 1, 1], [], []>} : vector<8x128xf32>, vector<128x16xf32>, vector<8x16xf32> -> vector<8x16xf32>
    %191 = arith.addf %20, %190 : vector<8x16xf32>
    %cst_65 = arith.constant dense<0.000000e+00> : vector<8x16xf32>
    %192 = tpu.matmul %191, %8, %cst_65 {dimension_numbers = #tpu.dot_dimension_numbers<[1], [0], [0], [1], [0, 0, 1, 1], [], []>} : vector<8x16xf32>, vector<16x16xf32>, vector<8x16xf32> -> vector<8x16xf32>
    %193 = vector.broadcast %9 : vector<1x16xf32> to vector<8x16xf32>
    %194 = arith.addf %192, %193 : vector<8x16xf32>
    %195 = math.tanh %194 : vector<8x16xf32>
    %196 = arith.mulf %1, %195 : vector<8x16xf32>
    %cst_66 = arith.constant dense<0.000000e+00> : vector<8xf32>
    %197 = vector.multi_reduction <add>, %196, %cst_66 [1] : vector<8x16xf32> to vector<8xf32>
    %198 = vector.shape_cast %197 : vector<8xf32> to vector<8x1xf32>
    %cst_67 = arith.constant 5.000000e-01 : f32
    %199 = vector.broadcast %cst_67 : f32 to vector<8x1xf32>
    %200 = arith.mulf %199, %198 : vector<8x1xf32>
    %201 = math.tanh %200 : vector<8x1xf32>
    %cst_68 = arith.constant 1.000000e+00 : f32
    %202 = vector.broadcast %cst_68 : f32 to vector<8x1xf32>
    %203 = arith.addf %201, %202 : vector<8x1xf32>
    %cst_69 = arith.constant 5.000000e-01 : f32
    %204 = vector.broadcast %cst_69 : f32 to vector<8x1xf32>
    %205 = arith.mulf %204, %203 : vector<8x1xf32>
    %cst_70 = arith.constant 0.000000e+00 : f32
    %206 = vector.broadcast %cst_70 : f32 to vector<8x1xf32>
    %207 = arith.maximumf %198, %206 : vector<8x1xf32>
    %208 = arith.mulf %198, %5 : vector<8x1xf32>
    %209 = arith.subf %207, %208 : vector<8x1xf32>
    %210 = math.absf %198 : vector<8x1xf32>
    %cst_71 = arith.constant 0.000000e+00 : f32
    %211 = vector.broadcast %cst_71 : f32 to vector<8x1xf32>
    %212 = arith.subf %211, %210 : vector<8x1xf32>
    %213 = math.exp %212 : vector<8x1xf32>
    %cst_72 = arith.constant 1.000000e+00 : f32
    %214 = vector.broadcast %cst_72 : f32 to vector<8x1xf32>
    %215 = arith.addf %214, %213 : vector<8x1xf32>
    %216 = math.log %215 : vector<8x1xf32>
    %217 = arith.addf %209, %216 : vector<8x1xf32>
    %c0_73 = arith.constant 0 : index
    %c0_74 = arith.constant 0 : index
    %218 = vector.load %arg14[%c0_73, %c0_74] : memref<8x2xf32, #tpu.memory_space<vmem>>, vector<8x1xf32>
    tpu.vector_store %arg14[%c0_73, %c0_74], %205 {strides = array<i32>} : memref<8x2xf32, #tpu.memory_space<vmem>>, vector<8x1xf32>,
    %c0_75 = arith.constant 0 : index
    %c1 = arith.constant 1 : index
    %219 = vector.load %arg14[%c0_75, %c1] : memref<8x2xf32, #tpu.memory_space<vmem>>, vector<8x1xf32>
    tpu.vector_store %arg14[%c0_75, %c1], %217 {strides = array<i32>} : memref<8x2xf32, #tpu.memory_space<vmem>>, vector<8x1xf32>,
    return
  }
  func.func @transform_0(%arg0: i32) -> (i32, i32) {
    %c0_i32 = arith.constant 0 : i32
    %c0_i32_0 = arith.constant 0 : i32
    return %arg0, %c0_i32 : i32, i32
  }
  func.func @transform_1(%arg0: i32) -> (i32, i32) {
    %c0_i32 = arith.constant 0 : i32
    %c0_i32_0 = arith.constant 0 : i32
    return %arg0, %c0_i32 : i32, i32
  }
  func.func @transform_2(%arg0: i32) -> (i32, i32) {
    %c0_i32 = arith.constant 0 : i32
    %c0_i32_0 = arith.constant 0 : i32
    return %arg0, %c0_i32 : i32, i32
  }
  func.func @transform_3(%arg0: i32) -> (i32, i32) {
    %c0_i32 = arith.constant 0 : i32
    %c0_i32_0 = arith.constant 0 : i32
    return %arg0, %c0_i32 : i32, i32
  }
  func.func @transform_4(%arg0: i32) -> (i32, i32) {
    %c0_i32 = arith.constant 0 : i32
    %c0_i32_0 = arith.constant 0 : i32
    return %arg0, %c0_i32 : i32, i32
  }
  func.func @transform_5(%arg0: i32) -> (i32, i32) {
    %c0_i32 = arith.constant 0 : i32
    %c0_i32_0 = arith.constant 0 : i32
    %c0_i32_1 = arith.constant 0 : i32
    return %c0_i32, %c0_i32_0 : i32, i32
  }
  func.func @transform_6(%arg0: i32) -> (i32, i32) {
    %c0_i32 = arith.constant 0 : i32
    %c0_i32_0 = arith.constant 0 : i32
    %c0_i32_1 = arith.constant 0 : i32
    return %c0_i32, %c0_i32_0 : i32, i32
  }
  func.func @transform_7(%arg0: i32) -> (i32, i32) {
    %c0_i32 = arith.constant 0 : i32
    %c0_i32_0 = arith.constant 0 : i32
    %c0_i32_1 = arith.constant 0 : i32
    return %c0_i32, %c0_i32_0 : i32, i32
  }
  func.func @transform_8(%arg0: i32) -> (i32, i32) {
    %c0_i32 = arith.constant 0 : i32
    %c0_i32_0 = arith.constant 0 : i32
    %c0_i32_1 = arith.constant 0 : i32
    return %c0_i32, %c0_i32_0 : i32, i32
  }
  func.func @transform_9(%arg0: i32) -> (i32, i32) {
    %c0_i32 = arith.constant 0 : i32
    %c0_i32_0 = arith.constant 0 : i32
    %c0_i32_1 = arith.constant 0 : i32
    return %c0_i32, %c0_i32_0 : i32, i32
  }
  func.func @transform_10(%arg0: i32) -> (i32, i32) {
    %c0_i32 = arith.constant 0 : i32
    %c0_i32_0 = arith.constant 0 : i32
    %c0_i32_1 = arith.constant 0 : i32
    return %c0_i32, %c0_i32_0 : i32, i32
  }
  func.func @transform_11(%arg0: i32) -> (i32, i32) {
    %c0_i32 = arith.constant 0 : i32
    %c0_i32_0 = arith.constant 0 : i32
    %c0_i32_1 = arith.constant 0 : i32
    return %c0_i32, %c0_i32_0 : i32, i32
  }
  func.func @transform_12(%arg0: i32) -> (i32, i32) {
    %c0_i32 = arith.constant 0 : i32
    %c0_i32_0 = arith.constant 0 : i32
    %c0_i32_1 = arith.constant 0 : i32
    return %c0_i32, %c0_i32_0 : i32, i32
  }
  func.func @transform_13(%arg0: i32) -> (i32, i32) {
    %c0_i32 = arith.constant 0 : i32
    %c0_i32_0 = arith.constant 0 : i32
    return %arg0, %c0_i32 : i32, i32
  }
}

</mosaic_0001>

<bundles_post_ra>
// kernel: tpu_custom_call.1
= control target key start
LH: loop header
LB: loop body
LE: loop exit
PB: predicated region body
PF: predicated region fallthrough
CT: control target
= control target key end

     0   :  { %v3783_v0 = vmov 1   ;;  %v3784_v1 = vmov 0   ;;  %v3785_v4 = vmov 0.0   ;;  %vm3786_vm0 = vmmov 0   ;;  %s3793_s26 = smov 1   ;;  %s4525_s3 = inlined_call_operand.vmem [shape: s32[8,8], index: 3, kind: input, shape index: {}]   ;;  %s4526_s5 = inlined_call_operand.vmem [shape: f32[64,16], index: 5, kind: input, shape index: {}]   ;;  %s4527_s6 = inlined_call_operand.vmem [shape: f32[8,16], index: 6, kind: input, shape index: {}]   ;;  %s4528_s2 = inlined_call_operand.vmem [shape: s32[8,8], index: 2, kind: input, shape index: {}]   ;;  %s4529_s10 = inlined_call_operand.vmem [shape: f32[8,128], index: 10, kind: input, shape index: {}]   ;;  %s4530_s11 = inlined_call_operand.vmem [shape: f32[16,128], index: 11, kind: input, shape index: {}]   ;;  %s4531_s9 = inlined_call_operand.vmem [shape: f32[128,8], index: 9, kind: input, shape index: {}]   ;;  %s4532_s0 = inlined_call_operand.vmem [shape: bf16[8,16], index: 0, kind: input, shape index: {}]   ;;  %s4533_s1 = inlined_call_operand.vmem [shape: s32[8,1], index: 1, kind: input, shape index: {}]   ;;  %s4534_s12 = inlined_call_operand.vmem [shape: f32[128,16], index: 12, kind: input, shape index: {}]   ;;  %s4535_s7 = inlined_call_operand.vmem [shape: f32[16,16], index: 7, kind: input, shape index: {}]   ;;  %s4536_s8 = inlined_call_operand.vmem [shape: f32[1,16], index: 8, kind: input, shape index: {}]   ;;  %s4537_s13 = inlined_call_operand.vmem [shape: f32[8,2], index: 13, kind: output, shape index: {}]   ;;  %s4538_s4 = inlined_call_operand.vmem [shape: f32[8,1], index: 4, kind: input, shape index: {}]  }
   0x1   :  { %3749 = vset.pattern.permute.xlu1 %v3783_v0  ;;  %3747 = vset.pattern.permute.xlu0 %v3784_v1  ;;  %v3868_v2 = vld [vmem:[%s4525_s3] sm:$0xff]  ;;  %v3873_v3 = vld [vmem:[%s4526_s5 + $0x38] sm:$0xff]  ;;  %v3895_v7 = vld [vmem:[%s4526_s5 + $0x30] sm:$0xff]  ;;  %v3787_v14 = vmov 2   ;;  %v97_v15 = vlaneseq  ;;  %vm197_vm1 = vcmask 64512   ;;  %vm117_vm3 = vcmask 523264  }
   0x2   :  { %357 = vperm.xlu1 %3749, %v3868_v2   ;;  %192 = vperm.xlu0 %3747, %v3868_v2   ;;  %v3882_v5 = vld [vmem:[%s4527_s6] sm:$0xff]  ;;  %v3905_v8 = vld [vmem:[%s4526_s5 + $0x28] sm:$0xff]  ;;  %v3922_v10 = vld [vmem:[%s4526_s5 + $0x18] sm:$0xff]  ;;  %v3788_v37 = vmov 3   ;;  %vm435_vm7 = vcmask 130048   ;;  %v3789_v57 = vmov 4  }
   0x3   :  { %3324 = vmatprep.subr.mxu0 %v3785_v4  ;;  %3343 = vmatprep.subr.mxu1 %v3785_v4  ;;  %v3887_v6 = vld [vmem:[%s4528_s2] sm:$0xff]  ;;  %v3929_v11 = vld [vmem:[%s4526_s5 + $0x10] sm:$0xff]  ;;  %v3936_v12 = vld [vmem:[%s4526_s5 + $0x8] sm:$0xff]  ;;  %v3951_v16 = vand.u32 127, %v97_v15  ;;  %v3991_v25 = vshrl.u32 %v97_v15, 7 }
   0x4   :  { %3325 = vmatpush3.msra.mxu0 %v3873_v3  ;;  %3344 = vmatpush3.msra.mxu1 %v3882_v5  ;;  %v3913_v9 = vld [vmem:[%s4526_s5 + $0x20] sm:$0xff]  ;;  %v4003_v29 = vld [vmem:[%s4530_s11 + $0x8] sm:$0xff] }
   0x5   :  { %3326 = vmatprep.subr.mxu0 %v3785_v4  ;;  %3345 = vmatprep.mubr.msk.f32.mxu1 %vm3786_vm0, %v3785_v4  ;;  %v3943_v13 = vld [vmem:[%s4526_s5] sm:$0xff]  ;;  %v107_v26 = vsub.s32 0, %v3991_v25  ;;  %v273_v33 = vsub.s32 1, %v3991_v25  ;;  %v730_v50 = vsub.s32 2, %v3991_v25 }
   0x6   :  { %3750 = vset.pattern.permute.xlu1 %v3784_v1  ;;  %3748 = vset.pattern.permute.xlu0 %v3783_v0  ;;  %v3997_v27 = vld [vmem:[%s4529_s10] sm:$0xff] }
   0x7   :  { %112 = vperm.xlu1 %3750, %v3887_v6   ;;  %278 = vperm.xlu0 %3748, %v3887_v6   ;;  %v108_v28 = vrot.slane %v3997_v27, %v107_v26  ;;  %v4009_v31 = vld [vmem:[%s4530_s11] sm:$0xff]  ;;  %v274_v34 = vrot.slane %v3997_v27, %v273_v33  ;;  %v731_v51 = vrot.slane %v3997_v27, %v730_v50 }
   0x8   :  { %3327 = vmatpush3.msra.mxu0 %v3895_v7  ;;  %3348 = vmatprep.subr.mxu1 %v3785_v4 }
   0x9   :  { %3328 = vmatprep.subr.mxu0 %v3785_v4  ;;  %3340 = vmatprep.mubr.msk.f32.mxu0 %vm3786_vm0, %v3785_v4  ;;  %v110_v30 = vmul.f32 %v108_v28, %v4003_v29  ;;  %v109_v32 = vmul.f32 %v108_v28, %v4009_v31  ;;  %v276_v35 = vmul.f32 %v274_v34, %v4003_v29 }
   0xa   :  { %3329 = vmatpush3.msra.mxu0 %v3905_v8  ;;  %v275_v36 = vmul.f32 %v274_v34, %v4009_v31  ;;  %v733_v52 = vmul.f32 %v731_v51, %v4003_v29  ;;  %v732_v53 = vmul.f32 %v731_v51, %v4009_v31 }
   0xb   :  { %3330 = vmatprep.subr.mxu0 %v3785_v4  ;;  %3751 = vset.pattern.permute.xlu1 %v3787_v14 }
   0xc   :  { %3331 = vmatpush3.msra.mxu0 %v3913_v9  ;;  %3752 = vset.pattern.permute.xlu0 %v3787_v14 }
   0xd   :  { %3332 = vmatprep.subr.mxu0 %v3785_v4  ;;  %735 = vperm.xlu1 %3751, %v3887_v6  }
   0xe   :  { %3333 = vmatpush3.msra.mxu0 %v3922_v10  ;;  %814 = vperm.xlu0 %3752, %v3868_v2  }
   0xf   :  { %3334 = vmatprep.subr.mxu0 %v3785_v4 }
  0x10   :  { %3335 = vmatpush3.msra.mxu0 %v3929_v11 }
  0x11   :  { %3336 = vmatprep.subr.mxu0 %v3785_v4  ;;  %3753 = vset.pattern.permute.xlu1 %v3788_v37 }
  0x12   :  { %3337 = vmatpush3.msra.mxu0 %v3936_v12  ;;  %1047 = vperm.xlu1 %3753, %v3887_v6  }
  0x13   :  { %3338 = vmatprep.subr.mxu0 %v3785_v4  ;;  %3754 = vset.pattern.permute.xlu0 %v3789_v57 }
  0x14   :  { %3339 = vmatpush3.msra.mxu0 %v3943_v13  ;;  %1359 = vperm.xlu0 %3754, %v3887_v6  }
  0x15   :  { %3379 = vmatprep.subr.mxu0 %v3785_v4 }
  0x16   :  { %1126 = vperm.xlu1 %3753, %v3868_v2  }
  0x1a   :  { %3755 = vset.pattern.permute.xlu1 %v3789_v57 }
  0x1b   :  { %1438 = vperm.xlu1 %3755, %v3868_v2  }
  0x7d   :  { %v193_v17 = vpop.permute.xlu0 %192  ;;  %v358_v18 = vpop.permute.xlu1 %357 }
  0x7e   :  { %vm194_vm2 = vcmp.eq.s32.totalorder %v193_v17, %v3951_v16  ;;  %vm359_vm6 = vcmp.eq.s32.totalorder %v358_v18, %v3951_v16 }
  0x7f   :  { %v3086_v19 = vsel %vm194_vm2, 1.0, %v3785_v4  ;;  %v3090_v24 = vsel %vm359_vm6, 1.0, %v3785_v4 }
  0x80   :  { %3346 = vmatmul.mubr.msk.f32.vlgmr.msra.gmra.mxu1 %vm197_vm1, %v3086_v19 }
  0x81   :  { %3349 = vmatpush3.msra.mxu1 %v3873_v3  ;;  %3364 = vmatprep.mubr.msk.f32.mxu1 %vm3786_vm0, %v3785_v4 }
  0x82   :  { %3350 = vmatprep.subr.mxu1 %v3785_v4  ;;  %v113_v20 = vpop.permute.xlu1 %112  ;;  %v279_v22 = vpop.permute.xlu0 %278 }
  0x83   :  { %3351 = vmatpush3.msra.mxu1 %v3895_v7  ;;  %vm114_vm4 = vcmp.eq.s32.totalorder %v113_v20, %v3951_v16  ;;  %vm280_vm5 = vcmp.eq.s32.totalorder %v279_v22, %v3951_v16 }
  0x84   :  { %v3084_v21 = vsel %vm114_vm4, 1.0, %v3785_v4  ;;  %3352 = vmatprep.subr.mxu1 %v3785_v4  ;;  %v3088_v23 = vsel %vm280_vm5, 1.0, %v3785_v4 }
  0x85   :  { %3353 = vmatpush3.msra.mxu1 %v3905_v8  ;;  %3341 = vmatmul.mubr.msk.f32.vlgmr.msra.gmra.mxu0 %vm117_vm3, %v3084_v21 }
  0x86   :  { %3354 = vmatprep.subr.mxu1 %v3785_v4  ;;  %3383 = vmatprep.mubr.msk.f32.mxu0 %vm3786_vm0, %v3785_v4 }
  0x87   :  { %3355 = vmatpush3.msra.mxu1 %v3913_v9  ;;  %3380 = vmatpush3.msra.mxu0 %v110_v30 }
  0x88   :  { %3356 = vmatprep.subr.mxu1 %v3785_v4  ;;  %3381 = vmatprep.subr.mxu0 %v3785_v4  ;;  %v736_v48 = vpop.permute.xlu1 %735 }
  0x89   :  { %3357 = vmatpush3.msra.mxu1 %v3922_v10  ;;  %3382 = vmatpush3.msra.mxu0 %v109_v32  ;;  %v815_v41 = vpop.permute.xlu0 %814  ;;  %vm737_vm9 = vcmp.eq.s32.totalorder %v736_v48, %v3951_v16 }
  0x8a   :  { %3358 = vmatprep.subr.mxu1 %v3785_v4  ;;  %3393 = vmatprep.subr.mxu0 %v3785_v4  ;;  %vm816_vm8 = vcmp.eq.s32.totalorder %v815_v41, %v3951_v16  ;;  %v3096_v49 = vsel %vm737_vm9, 1.0, %v3785_v4 }
  0x8b   :  { %3359 = vmatpush3.msra.mxu1 %v3929_v11  ;;  %v3098_v43 = vsel %vm816_vm8, 1.0, %v3785_v4 }
  0x8c   :  { %3360 = vmatprep.subr.mxu1 %v3785_v4 }
  0x8d   :  { %3361 = vmatpush3.msra.mxu1 %v3936_v12  ;;  %v1048_v54 = vpop.permute.xlu1 %1047 }
  0x8e   :  { %3362 = vmatprep.subr.mxu1 %v3785_v4  ;;  %vm1049_vm11 = vcmp.eq.s32.totalorder %v1048_v54, %v3951_v16  ;;  %v3791_v54 = vmov 6  }
  0x8f   :  { %3363 = vmatpush3.msra.mxu1 %v3943_v13  ;;  %v3102_v22 = vsel %vm1049_vm11, 1.0, %v3785_v4 }
  0x90   :  { %3365 = vmatmul.mubr.msk.f32.vlgmr.msra.gmra.mxu1 %vm117_vm3, %v3088_v23  ;;  %3367 = vmatprep.subr.mxu1 %v3785_v4  ;;  %v1042_v23 = vsub.s32 3, %v3991_v25 }
  0x91   :  { %3368 = vmatpush3.msra.mxu1 %v3882_v5  ;;  %3369 = vmatprep.mubr.msk.f32.mxu1 %vm3786_vm0, %v3785_v4  ;;  %v1127_v55 = vpop.permute.xlu1 %1126 }
  0x92   :  { %3372 = vmatprep.subr.mxu1 %v3785_v4  ;;  %vm1128_vm10 = vcmp.eq.s32.totalorder %v1127_v55, %v3951_v16 }
  0x93   :  { %v3104_v56 = vsel %vm1128_vm10, 1.0, %v3785_v4 }
  0x94   :  { %3370 = vmatmul.mubr.msk.f32.vlgmr.msra.gmra.mxu1 %vm197_vm1, %v3090_v24  ;;  %v1043_v24 = vrot.slane %v3997_v27, %v1042_v23 }
  0x95   :  { %3376 = vmatprep.mubr.msk.f32.mxu1 %vm3786_vm0, %v3785_v4  ;;  %3373 = vmatpush3.msra.mxu1 %v276_v35 }
  0x96   :  { %3374 = vmatprep.subr.mxu1 %v3785_v4  ;;  %v1045_v26 = vmul.f32 %v1043_v24, %v4003_v29  ;;  %v1044_v28 = vmul.f32 %v1043_v24, %v4009_v31  ;;  %v1439_v33 = vpop.permute.xlu1 %1438  ;;  %v3792_v24 = vmov 7  }
  0x97   :  { %3375 = vmatpush3.msra.mxu1 %v275_v36  ;;  %vm1440_vm12 = vcmp.eq.s32.totalorder %v1439_v33, %v3951_v16 }
  0x98   :  { %3386 = vmatprep.subr.mxu1 %v3785_v4  ;;  %v3110_v34 = vsel %vm1440_vm12, 1.0, %v3785_v4 }
 0x140   :  { %v267_v38 = vpop.f32.mrf.mxu1 }
 0x142   :  { %v3347_v39 = vpop.f32.mrf.mxu1 }
 0x145   :  { %v187_v40 = vpop.f32.mrf.mxu0 }
 0x146   :  { %3384 = vmatmul.mubr.msk.f32.vlgmr.msra.gmra.mxu0 %vm435_vm7, %v187_v40 }
 0x147   :  { %3394 = vmatpush3.msra.mxu0 %v110_v30  ;;  %3397 = vmatprep.mubr.msk.f32.mxu0 %vm3786_vm0, %v3785_v4  ;;  %v3342_v42 = vpop.f32.mrf.mxu0 }
 0x148   :  { %3395 = vmatprep.subr.mxu0 %v3785_v4 }
 0x149   :  { %3396 = vmatpush3.msra.mxu0 %v109_v32 }
 0x14a   :  { %3398 = vmatmul.mubr.msk.f32.vlgmr.msra.gmra.mxu0 %vm435_vm7, %v267_v38  ;;  %3419 = vmatprep.subr.mxu0 %v3785_v4 }
 0x14b   :  { %3420 = vmatpush3.msra.mxu0 %v3882_v5  ;;  %3421 = vmatprep.mubr.msk.f32.mxu0 %vm3786_vm0, %v3785_v4 }
 0x14c   :  { %3424 = vmatprep.subr.mxu0 %v3785_v4 }
 0x14e   :  { %3422 = vmatmul.mubr.msk.f32.vlgmr.msra.gmra.mxu0 %vm197_vm1, %v3098_v43 }
 0x14f   :  { %3428 = vmatprep.mubr.msk.f32.mxu0 %vm3786_vm0, %v3785_v4  ;;  %3425 = vmatpush3.msra.mxu0 %v733_v52 }
 0x150   :  { %v352_v44 = vpop.f32.mrf.mxu1  ;;  %3426 = vmatprep.subr.mxu0 %v3785_v4 }
 0x151   :  { %3377 = vmatmul.mubr.msk.f32.vlgmr.msra.gmra.mxu1 %vm435_vm7, %v352_v44  ;;  %3427 = vmatpush3.msra.mxu0 %v732_v53  ;;  %v1360_v44 = vpop.permute.xlu0 %1359 }
 0x152   :  { %3387 = vmatpush3.msra.mxu1 %v276_v35  ;;  %v3366_v45 = vpop.f32.mrf.mxu1  ;;  %3390 = vmatprep.mubr.msk.f32.mxu1 %vm3786_vm0, %v3785_v4  ;;  %v3790_v35 = vmov 5   ;;  %vm1361_vm13 = vcmp.eq.s32.totalorder %v1360_v44, %v3951_v16 }
 0x153   :  { %3388 = vmatprep.subr.mxu1 %v3785_v4  ;;  %3431 = vmatprep.subr.mxu0 %v3785_v4  ;;  %v3108_v45 = vsel %vm1361_vm13, 1.0, %v3785_v4 }
 0x154   :  { %3389 = vmatpush3.msra.mxu1 %v275_v36  ;;  %v431_v46 = vpop.f32.mrf.mxu1  ;;  %3756 = vset.pattern.permute.xlu1 %v3790_v35 }
 0x155   :  { %3400 = vmatprep.subr.mxu1 %v3785_v4  ;;  %3391 = vmatmul.mubr.msk.f32.vlgmr.msra.gmra.mxu1 %vm435_vm7, %v431_v46  ;;  %v1354_v46 = vsub.s32 4, %v3991_v25 }
 0x156   :  { %3401 = vmatpush3.msra.mxu1 %v3873_v3  ;;  %v3371_v47 = vpop.f32.mrf.mxu1  ;;  %3416 = vmatprep.mubr.msk.f32.mxu1 %vm3786_vm0, %v3785_v4 }
 0x157   :  { %3402 = vmatprep.subr.mxu1 %v3785_v4  ;;  %3757 = vset.pattern.permute.xlu0 %v3790_v35  ;;  %v1355_v47 = vrot.slane %v3997_v27, %v1354_v46 }
 0x158   :  { %3403 = vmatpush3.msra.mxu1 %v3895_v7  ;;  %1671 = vperm.xlu1 %3756, %v3887_v6  }
 0x159   :  { %3404 = vmatprep.subr.mxu1 %v3785_v4  ;;  %1750 = vperm.xlu0 %3757, %v3868_v2   ;;  %v1357_v48 = vmul.f32 %v1355_v47, %v4003_v29 }
 0x15a   :  { %3405 = vmatpush3.msra.mxu1 %v3905_v8 }
 0x15b   :  { %3406 = vmatprep.subr.mxu1 %v3785_v4 }
 0x15c   :  { %3407 = vmatpush3.msra.mxu1 %v3913_v9  ;;  %3758 = vset.pattern.permute.xlu1 %v3791_v54  ;;  %v72_v54 = vld [vmem:[%s4531_s9 + $0x50] sm:$0xff] }
 0x15d   :  { %3408 = vmatprep.subr.mxu1 %v3785_v4  ;;  %1983 = vperm.xlu1 %3758, %v3887_v6  }
 0x15e   :  { %3409 = vmatpush3.msra.mxu1 %v3922_v10  ;;  %3759 = vset.pattern.permute.xlu0 %v3792_v24 }
 0x15f   :  { %3410 = vmatprep.subr.mxu1 %v3785_v4  ;;  %2295 = vperm.xlu0 %3759, %v3887_v6  }
 0x160   :  { %3411 = vmatpush3.msra.mxu1 %v3929_v11 }
 0x161   :  { %3412 = vmatprep.subr.mxu1 %v3785_v4  ;;  %2062 = vperm.xlu1 %3758, %v3868_v2  }
 0x162   :  { %3413 = vmatpush3.msra.mxu1 %v3936_v12 }
 0x163   :  { %3414 = vmatprep.subr.mxu1 %v3785_v4  ;;  %3761 = vset.pattern.permute.xlu0 %v3784_v1 }
 0x164   :  { %3415 = vmatpush3.msra.mxu1 %v3943_v13 }
 0x165   :  { %3417 = vmatmul.mubr.msk.f32.vlgmr.msra.gmra.mxu1 %vm117_vm3, %v3096_v49  ;;  %3457 = vmatprep.subr.mxu1 %v3785_v4  ;;  %v1356_v49 = vmul.f32 %v1355_v47, %v4009_v31 }
 0x166   :  { %3458 = vmatpush3.msra.mxu1 %v3882_v5  ;;  %3459 = vmatprep.mubr.msk.f32.mxu1 %vm3786_vm0, %v3785_v4 }
 0x167   :  { %3462 = vmatprep.subr.mxu1 %v3785_v4  ;;  %3760 = vset.pattern.permute.xlu1 %v3792_v24 }
 0x168   :  { %2374 = vperm.xlu1 %3760, %v3868_v2   ;;  %v1978_v2 = vsub.s32 6, %v3991_v25 }
 0x169   :  { %3460 = vmatmul.mubr.msk.f32.vlgmr.msra.gmra.mxu1 %vm197_vm1, %v3104_v56 }
 0x16a   :  { %3466 = vmatprep.mubr.msk.f32.mxu1 %vm3786_vm0, %v3785_v4  ;;  %3463 = vmatpush3.msra.mxu1 %v1045_v26  ;;  %v1979_v6 = vrot.slane %v3997_v27, %v1978_v2  ;;  %v3777_v2 = vld [vmem:[%s4526_s5 + $0x28] sm:$0xff] }
 0x16b   :  { %3464 = vmatprep.subr.mxu1 %v3785_v4 }
 0x16c   :  { %3465 = vmatpush3.msra.mxu1 %v1044_v28 }
 0x16d   :  { %3469 = vmatprep.subr.mxu1 %v3785_v4 }
 0x206   :  { %v578_v58 = vpop.f32.mrf.mxu0 }
 0x208   :  { %v3385_v59 = vpop.f32.mrf.mxu0 }
 0x20a   :  { %v724_v60 = vpop.f32.mrf.mxu0 }
 0x20c   :  { %v3399_v61 = vpop.f32.mrf.mxu0 }
 0x20e   :  { %v888_v62 = vpop.f32.mrf.mxu0 }
 0x210   :  { %v3423_v63 = vpop.f32.mrf.mxu0 }
 0x211   :  { %v505_v0 = vpop.f32.mrf.mxu1  ;;  %v1672_v63 = vpop.permute.xlu1 %1671 }
 0x212   :  { %v579_v14 = vadd.f32 %v578_v58, %v505_v0  ;;  %vm1673_vm15 = vcmp.eq.s32.totalorder %v1672_v63, %v3951_v16 }
 0x213   :  { %v3378_v15 = vpop.f32.mrf.mxu1  ;;  %v3114_v0 = vsel %vm1673_vm15, 1.0, %v3785_v4 }
 0x215   :  { %v651_v17 = vpop.f32.mrf.mxu1 }
 0x216   :  { %v725_v18 = vadd.f32 %v724_v60, %v651_v17 }
 0x217   :  { %v3392_v19 = vpop.f32.mrf.mxu1 }
 0x225   :  { %v809_v20 = vpop.f32.mrf.mxu1 }
 0x226   :  { %3429 = vmatmul.mubr.msk.f32.vlgmr.msra.gmra.mxu0 %vm435_vm7, %v809_v20 }
 0x227   :  { %3432 = vmatpush3.msra.mxu0 %v733_v52  ;;  %v3418_v21 = vpop.f32.mrf.mxu1  ;;  %3435 = vmatprep.mubr.msk.f32.mxu0 %vm3786_vm0, %v3785_v4  ;;  %v1751_v52 = vpop.permute.xlu0 %1750 }
 0x228   :  { %3433 = vmatprep.subr.mxu0 %v3785_v4  ;;  %vm1752_vm14 = vcmp.eq.s32.totalorder %v1751_v52, %v3951_v16  ;;  %v1984_v21 = vpop.permute.xlu1 %1983  ;;  %v74_v52 = vld [vmem:[%s4531_s9 + $0x60] sm:$0xff] }
 0x229   :  { %3434 = vmatpush3.msra.mxu0 %v732_v53  ;;  %v1200_v30 = vpop.f32.mrf.mxu1  ;;  %v3116_v53 = vsel %vm1752_vm14, 1.0, %v3785_v4  ;;  %vm1985_vm4 = vcmp.eq.s32.totalorder %v1984_v21, %v3951_v16  ;;  %v62_v21 = vld [vmem:[%s4531_s9] sm:$0xff] }
 0x22a   :  { %3438 = vmatprep.subr.mxu0 %v3785_v4  ;;  %3436 = vmatmul.mubr.msk.f32.vlgmr.msra.gmra.mxu0 %vm435_vm7, %v888_v62  ;;  %v3120_v1 = vsel %vm1985_vm4, 1.0, %v3785_v4 }
 0x22b   :  { %3439 = vmatpush3.msra.mxu0 %v3873_v3  ;;  %3454 = vmatprep.mubr.msk.f32.mxu0 %vm3786_vm0, %v3785_v4  ;;  %v3461_v32 = vpop.f32.mrf.mxu1 }
 0x22c   :  { %3440 = vmatprep.subr.mxu0 %v3785_v4 }
 0x22d   :  { %3441 = vmatpush3.msra.mxu0 %v3895_v7 }
 0x22e   :  { %3442 = vmatprep.subr.mxu0 %v3785_v4 }
 0x22f   :  { %3443 = vmatpush3.msra.mxu0 %v3905_v8 }
 0x230   :  { %3444 = vmatprep.subr.mxu0 %v3785_v4 }
 0x231   :  { %3445 = vmatpush3.msra.mxu0 %v3913_v9 }
 0x232   :  { %3446 = vmatprep.subr.mxu0 %v3785_v4 }
 0x233   :  { %3447 = vmatpush3.msra.mxu0 %v3922_v10 }
 0x234   :  { %3448 = vmatprep.subr.mxu0 %v3785_v4 }
 0x235   :  { %3449 = vmatpush3.msra.mxu0 %v3929_v11 }
 0x236   :  { %3450 = vmatprep.subr.mxu0 %v3785_v4 }
 0x237   :  { %3451 = vmatpush3.msra.mxu0 %v3936_v12 }
 0x238   :  { %3452 = vmatprep.subr.mxu0 %v3785_v4 }
 0x239   :  { %3453 = vmatpush3.msra.mxu0 %v3943_v13 }
 0x23a   :  { %3455 = vmatmul.mubr.msk.f32.vlgmr.msra.gmra.mxu0 %vm117_vm3, %v3102_v22  ;;  %3495 = vmatprep.subr.mxu0 %v3785_v4  ;;  %v2063_v22 = vpop.permute.xlu1 %2062 }
 0x23b   :  { %3496 = vmatpush3.msra.mxu0 %v3882_v5  ;;  %3497 = vmatprep.mubr.msk.f32.mxu0 %vm3786_vm0, %v3785_v4  ;;  %vm2064_vm2 = vcmp.eq.s32.totalorder %v2063_v22, %v3951_v16 }
 0x23c   :  { %3500 = vmatprep.subr.mxu0 %v3785_v4  ;;  %v3122_v23 = vsel %vm2064_vm2, 1.0, %v3785_v4 }
 0x23e   :  { %3498 = vmatmul.mubr.msk.f32.vlgmr.msra.gmra.mxu0 %vm197_vm1, %v3110_v34 }
 0x23f   :  { %3504 = vmatprep.mubr.msk.f32.mxu0 %vm3786_vm0, %v3785_v4  ;;  %3501 = vmatpush3.msra.mxu0 %v1357_v48 }
 0x240   :  { %3502 = vmatprep.subr.mxu0 %v3785_v4 }
 0x241   :  { %3503 = vmatpush3.msra.mxu0 %v1356_v49 }
 0x242   :  { %3507 = vmatprep.subr.mxu0 %v3785_v4 }
 0x2e6   :  { %v961_v36 = vpop.f32.mrf.mxu0 }
 0x2e7   :  { %v965_v37 = vadd.f32 %v961_v36, %v579_v14  ;;  %v1666_v14 = vsub.s32 5, %v3991_v25 }
 0x2e8   :  { %v3430_v38 = vpop.f32.mrf.mxu0 }
 0x2e9   :  { %v1667_v15 = vrot.slane %v3997_v27, %v1666_v14  ;;  %v1980_v38 = vmul.f32 %v1979_v6, %v4009_v31 }
 0x2ea   :  { %v1035_v39 = vpop.f32.mrf.mxu0 }
 0x2eb   :  { %v1039_v40 = vadd.f32 %v1035_v39, %v725_v18  ;;  %v1669_v17 = vmul.f32 %v1667_v15, %v4003_v29  ;;  %v1668_v18 = vmul.f32 %v1667_v15, %v4009_v31 }
 0x2ec   :  { %v3437_v41 = vpop.f32.mrf.mxu0 }
 0x2fa   :  { %v1121_v42 = vpop.f32.mrf.mxu0 }
 0x2fb   :  { %3467 = vmatmul.mubr.msk.f32.vlgmr.msra.gmra.mxu1 %vm435_vm7, %v1121_v42 }
 0x2fc   :  { %3470 = vmatpush3.msra.mxu1 %v1045_v26  ;;  %v3456_v43 = vpop.f32.mrf.mxu0  ;;  %3473 = vmatprep.mubr.msk.f32.mxu1 %vm3786_vm0, %v3785_v4 }
 0x2fd   :  { %3471 = vmatprep.subr.mxu1 %v3785_v4 }
 0x2fe   :  { %3472 = vmatpush3.msra.mxu1 %v1044_v28  ;;  %v1512_v50 = vpop.f32.mrf.mxu0 }
 0x2ff   :  { %3476 = vmatprep.subr.mxu1 %v3785_v4  ;;  %3474 = vmatmul.mubr.msk.f32.vlgmr.msra.gmra.mxu1 %vm435_vm7, %v1200_v30 }
 0x300   :  { %3477 = vmatpush3.msra.mxu1 %v3873_v3  ;;  %3492 = vmatprep.mubr.msk.f32.mxu1 %vm3786_vm0, %v3785_v4  ;;  %v3499_v51 = vpop.f32.mrf.mxu0 }
 0x301   :  { %3478 = vmatprep.subr.mxu1 %v3785_v4  ;;  %v75_v51 = vld [vmem:[%s4531_s9 + $0x68] sm:$0xff] }
 0x302   :  { %3479 = vmatpush3.msra.mxu1 %v3895_v7 }
 0x303   :  { %3480 = vmatprep.subr.mxu1 %v3785_v4 }
 0x304   :  { %3481 = vmatpush3.msra.mxu1 %v3905_v8 }
 0x305   :  { %3482 = vmatprep.subr.mxu1 %v3785_v4 }
 0x306   :  { %3483 = vmatpush3.msra.mxu1 %v3913_v9 }
 0x307   :  { %3484 = vmatprep.subr.mxu1 %v3785_v4 }
 0x308   :  { %3485 = vmatpush3.msra.mxu1 %v3922_v10 }
 0x309   :  { %3486 = vmatprep.subr.mxu1 %v3785_v4 }
 0x30a   :  { %3487 = vmatpush3.msra.mxu1 %v3929_v11 }
 0x30b   :  { %3488 = vmatprep.subr.mxu1 %v3785_v4 }
 0x30c   :  { %3489 = vmatpush3.msra.mxu1 %v3936_v12 }
 0x30d   :  { %3490 = vmatprep.subr.mxu1 %v3785_v4 }
 0x30e   :  { %3491 = vmatpush3.msra.mxu1 %v3943_v13 }
 0x30f   :  { %3493 = vmatmul.mubr.msk.f32.vlgmr.msra.gmra.mxu1 %vm117_vm3, %v3108_v45  ;;  %3533 = vmatprep.subr.mxu1 %v3785_v4 }
 0x310   :  { %3534 = vmatpush3.msra.mxu1 %v3882_v5  ;;  %3535 = vmatprep.mubr.msk.f32.mxu1 %vm3786_vm0, %v3785_v4 }
 0x311   :  { %3538 = vmatprep.subr.mxu1 %v3785_v4 }
 0x313   :  { %3536 = vmatmul.mubr.msk.f32.vlgmr.msra.gmra.mxu1 %vm197_vm1, %v3116_v53  ;;  %v73_v53 = vld [vmem:[%s4531_s9 + $0x58] sm:$0xff] }
 0x314   :  { %3542 = vmatprep.mubr.msk.f32.mxu1 %vm3786_vm0, %v3785_v4  ;;  %3539 = vmatpush3.msra.mxu1 %v1669_v17 }
 0x315   :  { %3540 = vmatprep.subr.mxu1 %v3785_v4 }
 0x316   :  { %3541 = vmatpush3.msra.mxu1 %v1668_v18 }
 0x317   :  { %3545 = vmatprep.subr.mxu1 %v3785_v4 }
 0x3bb   :  { %v1273_v55 = vpop.f32.mrf.mxu1 }
 0x3bc   :  { %v1277_v56 = vadd.f32 %v1273_v55, %v965_v37  ;;  %v1981_v37 = vmul.f32 %v1979_v6, %v4003_v29  ;;  %v71_v55 = vld [vmem:[%s4531_s9 + $0x48] sm:$0xff]  ;;  %v3778_v6 = vld [vmem:[%s4526_s5 + $0x20] sm:$0xff] }
 0x3bd   :  { %v3468_v57 = vpop.f32.mrf.mxu1 }
 0x3be   :  { %v69_v57 = vld [vmem:[%s4531_s9 + $0x38] sm:$0xff] }
 0x3bf   :  { %v1347_v58 = vpop.f32.mrf.mxu1 }
 0x3c0   :  { %v1351_v59 = vadd.f32 %v1347_v58, %v1039_v40  ;;  %v2375_v40 = vpop.permute.xlu1 %2374  ;;  %v68_v58 = vld [vmem:[%s4531_s9 + $0x30] sm:$0xff] }
 0x3c1   :  { %v3475_v60 = vpop.f32.mrf.mxu1  ;;  %vm2376_vm5 = vcmp.eq.s32.totalorder %v2375_v40, %v3951_v16 }
 0x3c2   :  { %v3128_v41 = vsel %vm2376_vm5, 1.0, %v3785_v4 }
 0x3cf   :  { %v1433_v61 = vpop.f32.mrf.mxu1 }
 0x3d0   :  { %3505 = vmatmul.mubr.msk.f32.vlgmr.msra.gmra.mxu0 %vm435_vm7, %v1433_v61 }
 0x3d1   :  { %3508 = vmatpush3.msra.mxu0 %v1357_v48  ;;  %v3494_v62 = vpop.f32.mrf.mxu1  ;;  %3511 = vmatprep.mubr.msk.f32.mxu0 %vm3786_vm0, %v3785_v4 }
 0x3d2   :  { %3509 = vmatprep.subr.mxu0 %v3785_v4 }
 0x3d3   :  { %3510 = vmatpush3.msra.mxu0 %v1356_v49  ;;  %v1824_v19 = vpop.f32.mrf.mxu1 }
 0x3d4   :  { %3514 = vmatprep.subr.mxu0 %v3785_v4  ;;  %3512 = vmatmul.mubr.msk.f32.vlgmr.msra.gmra.mxu0 %vm435_vm7, %v1512_v50  ;;  %v2296_v50 = vpop.permute.xlu0 %2295 }
 0x3d5   :  { %3515 = vmatpush3.msra.mxu0 %v3873_v3  ;;  %3530 = vmatprep.mubr.msk.f32.mxu0 %vm3786_vm0, %v3785_v4  ;;  %v3537_v20 = vpop.f32.mrf.mxu1  ;;  %vm2297_vm6 = vcmp.eq.s32.totalorder %v2296_v50, %v3951_v16 }
 0x3d6   :  { %3516 = vmatprep.subr.mxu0 %v3785_v4  ;;  %v63_v20 = vld [vmem:[%s4531_s9 + $0x8] sm:$0xff] }
 0x3d7   :  { %3517 = vmatpush3.msra.mxu0 %v3895_v7 }
 0x3d8   :  { %3518 = vmatprep.subr.mxu0 %v3785_v4 }
 0x3d9   :  { %3519 = vmatpush3.msra.mxu0 %v3905_v8 }
 0x3da   :  { %3520 = vmatprep.subr.mxu0 %v3785_v4 }
 0x3db   :  { %3521 = vmatpush3.msra.mxu0 %v3913_v9 }
 0x3dc   :  { %3522 = vmatprep.subr.mxu0 %v3785_v4 }
 0x3dd   :  { %3523 = vmatpush3.msra.mxu0 %v3922_v10 }
 0x3de   :  { %3524 = vmatprep.subr.mxu0 %v3785_v4 }
 0x3df   :  { %3525 = vmatpush3.msra.mxu0 %v3929_v11 }
 0x3e0   :  { %3526 = vmatprep.subr.mxu0 %v3785_v4 }
 0x3e1   :  { %3527 = vmatpush3.msra.mxu0 %v3936_v12 }
 0x3e2   :  { %3528 = vmatprep.subr.mxu0 %v3785_v4 }
 0x3e3   :  { %3529 = vmatpush3.msra.mxu0 %v3943_v13 }
 0x3e4   :  { %3531 = vmatmul.mubr.msk.f32.vlgmr.msra.gmra.mxu0 %vm117_vm3, %v3114_v0  ;;  %3571 = vmatprep.subr.mxu0 %v3785_v4 }
 0x3e5   :  { %3572 = vmatpush3.msra.mxu0 %v3882_v5  ;;  %3573 = vmatprep.mubr.msk.f32.mxu0 %vm3786_vm0, %v3785_v4 }
 0x3e6   :  { %3576 = vmatprep.subr.mxu0 %v3785_v4 }
 0x3e8   :  { %3574 = vmatmul.mubr.msk.f32.vlgmr.msra.gmra.mxu0 %vm197_vm1, %v3122_v23 }
 0x3e9   :  { %3580 = vmatprep.mubr.msk.f32.mxu0 %vm3786_vm0, %v3785_v4  ;;  %3577 = vmatpush3.msra.mxu0 %v1981_v37 }
 0x3ea   :  { %3578 = vmatprep.subr.mxu0 %v3785_v4 }
 0x3eb   :  { %3579 = vmatpush3.msra.mxu0 %v1980_v38 }
 0x3ec   :  { %3583 = vmatprep.subr.mxu0 %v3785_v4 }
 0x490   :  { %v1585_v26 = vpop.f32.mrf.mxu0 }
 0x491   :  { %v1589_v28 = vadd.f32 %v1585_v26, %v1277_v56  ;;  %v70_v56 = vld [vmem:[%s4531_s9 + $0x40] sm:$0xff] }
 0x492   :  { %v3506_v30 = vpop.f32.mrf.mxu0 }
 0x494   :  { %v1659_v32 = vpop.f32.mrf.mxu0 }
 0x495   :  { %v1663_v33 = vadd.f32 %v1659_v32, %v1351_v59 }
 0x496   :  { %v3513_v34 = vpop.f32.mrf.mxu0 }
 0x4a4   :  { %v1745_v35 = vpop.f32.mrf.mxu0 }
 0x4a5   :  { %3543 = vmatmul.mubr.msk.f32.vlgmr.msra.gmra.mxu1 %vm435_vm7, %v1745_v35 }
 0x4a6   :  { %3546 = vmatpush3.msra.mxu1 %v1669_v17  ;;  %v3532_v36 = vpop.f32.mrf.mxu0  ;;  %3549 = vmatprep.mubr.msk.f32.mxu1 %vm3786_vm0, %v3785_v4  ;;  %v4345_v17 = vld [vmem:[%s4532_s0] sm:$0xf] }
 0x4a7   :  { %3547 = vmatprep.subr.mxu1 %v3785_v4  ;;  %v3775_v36 = vld [vmem:[%s4526_s5 + $0x38] sm:$0xff] }
 0x4a8   :  { %3548 = vmatpush3.msra.mxu1 %v1668_v18  ;;  %v45_v18 = vunpack.c.l.bf16 %v4345_v17  ;;  %v49_v17 = vld [vmem:[%s4538_s4] sm:$0xff] }
 0x4a9   :  { %3552 = vmatprep.subr.mxu1 %v3785_v4  ;;  %3550 = vmatmul.mubr.msk.f32.vlgmr.msra.gmra.mxu1 %vm435_vm7, %v1824_v19  ;;  %v64_v19 = vld [vmem:[%s4531_s9 + $0x10] sm:$0xff] }
 0x4aa   :  { %3553 = vmatpush3.msra.mxu1 %v3873_v3  ;;  %3568 = vmatprep.mubr.msk.f32.mxu1 %vm3786_vm0, %v3785_v4 }
 0x4ab   :  { %3554 = vmatprep.subr.mxu1 %v3785_v4 }
 0x4ac   :  { %3555 = vmatpush3.msra.mxu1 %v3895_v7 }
 0x4ad   :  { %3556 = vmatprep.subr.mxu1 %v3785_v4 }
 0x4ae   :  { %3557 = vmatpush3.msra.mxu1 %v3905_v8 }
 0x4af   :  { %3558 = vmatprep.subr.mxu1 %v3785_v4 }
 0x4b0   :  { %3559 = vmatpush3.msra.mxu1 %v3913_v9 }
 0x4b1   :  { %3560 = vmatprep.subr.mxu1 %v3785_v4 }
 0x4b2   :  { %3561 = vmatpush3.msra.mxu1 %v3922_v10 }
 0x4b3   :  { %3562 = vmatprep.subr.mxu1 %v3785_v4 }
 0x4b4   :  { %3563 = vmatpush3.msra.mxu1 %v3929_v11 }
 0x4b5   :  { %3564 = vmatprep.subr.mxu1 %v3785_v4 }
 0x4b6   :  { %3565 = vmatpush3.msra.mxu1 %v3936_v12 }
 0x4b7   :  { %3566 = vmatprep.subr.mxu1 %v3785_v4 }
 0x4b8   :  { %3567 = vmatpush3.msra.mxu1 %v3943_v13 }
 0x4b9   :  { %3569 = vmatmul.mubr.msk.f32.vlgmr.msra.gmra.mxu1 %vm117_vm3, %v3120_v1  ;;  %3609 = vmatprep.subr.mxu1 %v3785_v4  ;;  %v3776_v1 = vld [vmem:[%s4526_s5 + $0x30] sm:$0xff] }
 0x4ba   :  { %3610 = vmatpush3.msra.mxu1 %v3882_v5  ;;  %3611 = vmatprep.mubr.msk.f32.mxu1 %vm3786_vm0, %v3785_v4  ;;  %v2136_v5 = vpop.f32.mrf.mxu0 }
 0x4bb   :  { %3614 = vmatprep.subr.mxu1 %v3785_v4 }
 0x4bc   :  { %v3575_v39 = vpop.f32.mrf.mxu0 }
 0x4bd   :  { %3612 = vmatmul.mubr.msk.f32.vlgmr.msra.gmra.mxu1 %vm197_vm1, %v3128_v41  ;;  %v3782_v39 = vld [vmem:[%s4526_s5] sm:$0xff] }
 0x4be   :  { %3618 = vmatprep.mubr.msk.f32.mxu1 %vm3786_vm0, %v3785_v4 }
 0x565   :  { %v1897_v42 = vpop.f32.mrf.mxu1 }
 0x566   :  { %v4258_v43 = vadd.f32 %v1897_v42, %v1589_v28 }
 0x567   :  { %v3544_v44 = vpop.f32.mrf.mxu1 }
 0x569   :  { %v1971_v45 = vpop.f32.mrf.mxu1 }
 0x56a   :  { %v4260_v46 = vadd.f32 %v1971_v45, %v1663_v33 }
 0x56b   :  { %v3551_v47 = vpop.f32.mrf.mxu1 }
 0x579   :  { %v2057_v48 = vpop.f32.mrf.mxu1 }
 0x57a   :  { %3581 = vmatmul.mubr.msk.f32.vlgmr.msra.gmra.mxu0 %vm435_vm7, %v2057_v48  ;;  %v46_v48 = vld [vmem:[%s4533_s1] sm:$0xff] }
 0x57b   :  { %3584 = vmatpush3.msra.mxu0 %v1981_v37  ;;  %v3570_v49 = vpop.f32.mrf.mxu1  ;;  %3587 = vmatprep.mubr.msk.f32.mxu0 %vm3786_vm0, %v3785_v4  ;;  %v3779_v37 = vld [vmem:[%s4526_s5 + $0x18] sm:$0xff] }
 0x57c   :  { %3585 = vmatprep.subr.mxu0 %v3785_v4 }
 0x57d   :  { %3586 = vmatpush3.msra.mxu0 %v1980_v38  ;;  %v3780_v38 = vld [vmem:[%s4526_s5 + $0x10] sm:$0xff] }
 0x57e   :  { %3590 = vmatprep.subr.mxu0 %v3785_v4  ;;  %3588 = vmatmul.mubr.msk.f32.vlgmr.msra.gmra.mxu0 %vm435_vm7, %v2136_v5  ;;  %v3781_v5 = vld [vmem:[%s4526_s5 + $0x8] sm:$0xff] }
 0x57f   :  { %3591 = vmatpush3.msra.mxu0 %v3873_v3  ;;  %3606 = vmatprep.mubr.msk.f32.mxu0 %vm3786_vm0, %v3785_v4  ;;  %v3126_v3 = vsel %vm2297_vm6, 1.0, %v3785_v4 }
 0x580   :  { %3592 = vmatprep.subr.mxu0 %v3785_v4 }
 0x581   :  { %3593 = vmatpush3.msra.mxu0 %v3895_v7  ;;  %v2290_v7 = vsub.s32 7, %v3991_v25  ;;  %v76_v25 = vld [vmem:[%s4531_s9 + $0x70] sm:$0xff] }
 0x582   :  { %3594 = vmatprep.subr.mxu0 %v3785_v4 }
 0x583   :  { %3595 = vmatpush3.msra.mxu0 %v3905_v8  ;;  %v2291_v8 = vrot.slane %v3997_v27, %v2290_v7 }
 0x584   :  { %3596 = vmatprep.subr.mxu0 %v3785_v4 }
 0x585   :  { %3597 = vmatpush3.msra.mxu0 %v3913_v9  ;;  %v2293_v9 = vmul.f32 %v2291_v8, %v4003_v29 }
 0x586   :  { %3598 = vmatprep.subr.mxu0 %v3785_v4 }
 0x587   :  { %3599 = vmatpush3.msra.mxu0 %v3922_v10  ;;  %3615 = vmatpush3.msra.mxu1 %v2293_v9  ;;  %v2292_v10 = vmul.f32 %v2291_v8, %v4009_v31  ;;  %v96_v8 = vld [vmem:[%s4534_s12 + $0x78] sm:$0xff] }
 0x588   :  { %3600 = vmatprep.subr.mxu0 %v3785_v4  ;;  %3616 = vmatprep.subr.mxu1 %v3785_v4 }
 0x589   :  { %3601 = vmatpush3.msra.mxu0 %v3929_v11  ;;  %3617 = vmatpush3.msra.mxu1 %v2292_v10  ;;  %v2448_v11 = vpop.f32.mrf.mxu1 }
 0x58a   :  { %3602 = vmatprep.subr.mxu0 %v3785_v4  ;;  %3621 = vmatprep.subr.mxu1 %v3785_v4 }
 0x58b   :  { %3603 = vmatpush3.msra.mxu0 %v3936_v12  ;;  %v3613_v12 = vpop.f32.mrf.mxu1 }
 0x58c   :  { %3604 = vmatprep.subr.mxu0 %v3785_v4  ;;  %v91_v12 = vld [vmem:[%s4534_s12 + $0x50] sm:$0xff] }
 0x58d   :  { %3605 = vmatpush3.msra.mxu0 %v3943_v13  ;;  %v77_v13 = vld [vmem:[%s4531_s9 + $0x78] sm:$0xff] }
 0x58e   :  { %3607 = vmatmul.mubr.msk.f32.vlgmr.msra.gmra.mxu0 %vm117_vm3, %v3126_v3  ;;  %3635 = vmatprep.subr.mxu0 %v3785_v4 }
 0x58f   :  { %3667 = vmatprep.mubr.msk.f32.mxu0 %vm3786_vm0, %v3785_v4  ;;  %3636 = vmatpush3.msra.mxu0 %v77_v13  ;;  %v90_v13 = vld [vmem:[%s4534_s12 + $0x48] sm:$0xff] }
 0x590   :  { %3637 = vmatprep.subr.mxu0 %v3785_v4 }
 0x591   :  { %3638 = vmatpush3.msra.mxu0 %v76_v25  ;;  %v89_v25 = vld [vmem:[%s4534_s12 + $0x40] sm:$0xff] }
 0x592   :  { %3639 = vmatprep.subr.mxu0 %v3785_v4 }
 0x593   :  { %3640 = vmatpush3.msra.mxu0 %v75_v51  ;;  %v88_v51 = vld [vmem:[%s4534_s12 + $0x38] sm:$0xff] }
 0x594   :  { %3641 = vmatprep.subr.mxu0 %v3785_v4 }
 0x595   :  { %3642 = vmatpush3.msra.mxu0 %v74_v52  ;;  %v87_v52 = vld [vmem:[%s4534_s12 + $0x30] sm:$0xff] }
 0x596   :  { %3643 = vmatprep.subr.mxu0 %v3785_v4 }
 0x597   :  { %3644 = vmatpush3.msra.mxu0 %v73_v53  ;;  %v86_v53 = vld [vmem:[%s4534_s12 + $0x28] sm:$0xff] }
 0x598   :  { %3645 = vmatprep.subr.mxu0 %v3785_v4 }
 0x599   :  { %3646 = vmatpush3.msra.mxu0 %v72_v54  ;;  %v85_v54 = vld [vmem:[%s4534_s12 + $0x20] sm:$0xff] }
 0x59a   :  { %3647 = vmatprep.subr.mxu0 %v3785_v4 }
 0x59b   :  { %3648 = vmatpush3.msra.mxu0 %v71_v55  ;;  %v84_v55 = vld [vmem:[%s4534_s12 + $0x18] sm:$0xff] }
 0x59c   :  { %3649 = vmatprep.subr.mxu0 %v3785_v4 }
 0x59d   :  { %3650 = vmatpush3.msra.mxu0 %v70_v56  ;;  %v83_v56 = vld [vmem:[%s4534_s12 + $0x10] sm:$0xff] }
 0x59e   :  { %3651 = vmatprep.subr.mxu0 %v3785_v4 }
 0x59f   :  { %3652 = vmatpush3.msra.mxu0 %v69_v57  ;;  %v82_v57 = vld [vmem:[%s4534_s12 + $0x8] sm:$0xff] }
 0x5a0   :  { %3653 = vmatprep.subr.mxu0 %v3785_v4 }
 0x5a1   :  { %3654 = vmatpush3.msra.mxu0 %v68_v58  ;;  %v81_v58 = vld [vmem:[%s4534_s12] sm:$0xff] }
 0x5a2   :  { %3655 = vmatprep.subr.mxu0 %v3785_v4 }
 0x63a   :  { %v2209_v59 = vpop.f32.mrf.mxu0 }
 0x63b   :  { %v2213_v60 = vadd.f32 %v2209_v59, %v4258_v43 }
 0x63c   :  { %v3582_v61 = vpop.f32.mrf.mxu0 }
 0x63e   :  { %v2283_v62 = vpop.f32.mrf.mxu0 }
 0x63f   :  { %v2287_v63 = vadd.f32 %v2283_v62, %v4260_v46 }
 0x640   :  { %v3589_v0 = vpop.f32.mrf.mxu0 }
 0x641   :  { %v60_v0 = vld [vmem:[%s4535_s7 + $0x8] sm:$0xff] }
 0x64e   :  { %v2369_v14 = vpop.f32.mrf.mxu0 }
 0x64f   :  { %3619 = vmatmul.mubr.msk.f32.vlgmr.msra.gmra.mxu1 %vm435_vm7, %v2369_v14  ;;  %v59_v14 = vld [vmem:[%s4535_s7] sm:$0xff] }
 0x650   :  { %v3608_v15 = vpop.f32.mrf.mxu0  ;;  %3622 = vmatpush3.msra.mxu1 %v2293_v9  ;;  %3625 = vmatprep.mubr.msk.f32.mxu1 %vm3786_vm0, %v3785_v4 }
 0x651   :  { %3623 = vmatprep.subr.mxu1 %v3785_v4 }
 0x652   :  { %3624 = vmatpush3.msra.mxu1 %v2292_v10  ;;  %v95_v10 = vld [vmem:[%s4534_s12 + $0x70] sm:$0xff] }
 0x653   :  { %3626 = vmatmul.mubr.msk.f32.vlgmr.msra.gmra.mxu1 %vm435_vm7, %v2448_v11  ;;  %3628 = vmatprep.subr.mxu1 %v3785_v4  ;;  %v92_v11 = vld [vmem:[%s4534_s12 + $0x58] sm:$0xff] }
 0x654   :  { %3629 = vmatpush3.msra.mxu1 %v4003_v29  ;;  %3632 = vmatprep.mubr.msk.f32.mxu1 %vm3786_vm0, %v3785_v4  ;;  %v67_v29 = vld [vmem:[%s4531_s9 + $0x28] sm:$0xff] }
 0x655   :  { %3630 = vmatprep.subr.mxu1 %v3785_v4  ;;  %3656 = vmatpush3.msra.mxu0 %v67_v29 }
 0x656   :  { %3631 = vmatpush3.msra.mxu1 %v4009_v31  ;;  %3657 = vmatprep.subr.mxu0 %v3785_v4  ;;  %v66_v31 = vld [vmem:[%s4531_s9 + $0x20] sm:$0xff] }
 0x657   :  { %3633 = vmatmul.mubr.msk.f32.vlgmr.msra.gmra.mxu1 %vm435_vm7, %v45_v18  ;;  %3670 = vmatprep.subr.mxu1 %v3785_v4 }
 0x658   :  { %3671 = vmatpush3.msra.mxu1 %v3997_v27  ;;  %3672 = vmatprep.mubr.msk.f32.mxu1 %vm3786_vm0, %v3785_v4  ;;  %v65_v27 = vld [vmem:[%s4531_s9 + $0x18] sm:$0xff] }
 0x659   :  { %3675 = vmatprep.subr.mxu1 %v3785_v4  ;;  %3658 = vmatpush3.msra.mxu0 %v66_v31 }
 0x65a   :  { %3659 = vmatprep.subr.mxu0 %v3785_v4 }
 0x65b   :  { %3660 = vmatpush3.msra.mxu0 %v65_v27  ;;  %v3135_v27 = vld [vmem:[%s4536_s8] ss:$0 sm:$0xff] }
 0x65c   :  { %3661 = vmatprep.subr.mxu0 %v3785_v4 }
 0x65d   :  { %3662 = vmatpush3.msra.mxu0 %v64_v19 }
 0x65e   :  { %3663 = vmatprep.subr.mxu0 %v3785_v4 }
 0x65f   :  { %3664 = vmatpush3.msra.mxu0 %v63_v20 }
 0x660   :  { %3665 = vmatprep.subr.mxu0 %v3785_v4 }
 0x661   :  { %3666 = vmatpush3.msra.mxu0 %v62_v21 }
 0x662   :  { %3710 = vmatprep.subr.mxu0 %v3785_v4 }
 0x70f   :  { %v2521_v22 = vpop.f32.mrf.mxu1 }
 0x710   :  { %v4388_v23 = vadd.f32 %v2521_v22, %v2213_v60 }
 0x711   :  { %v3620_v26 = vpop.f32.mrf.mxu1 }
 0x713   :  { %v2595_v28 = vpop.f32.mrf.mxu1 }
 0x714   :  { %v2599_v32 = vadd.f32 %v2595_v28, %v2287_v63 }
 0x715   :  { %v3627_v30 = vpop.f32.mrf.mxu1 }
 0x717   :  { %v2669_v33 = vpop.f32.mrf.mxu1 }
 0x718   :  { %v2673_v34 = vmul.f32 %v2669_v33, %v2599_v32 }
 0x719   :  { %v3634_v35 = vpop.f32.mrf.mxu1 }
 0x71a   :  { %3668 = vmatmul.mubr.f32.vlgmr.msra.gmra.mxu0 %v2673_v34 }
 0x71b   :  { %3711 = vmatpush3.msra.mxu0 %v3775_v36  ;;  %3726 = vmatprep.mubr.msk.f32.mxu0 %vm3786_vm0, %v3785_v4 }
 0x71c   :  { %3712 = vmatprep.subr.mxu0 %v3785_v4 }
 0x71d   :  { %3713 = vmatpush3.msra.mxu0 %v3776_v1 }
 0x71e   :  { %3714 = vmatprep.subr.mxu0 %v3785_v4 }
 0x71f   :  { %3715 = vmatpush3.msra.mxu0 %v3777_v2 }
 0x720   :  { %3716 = vmatprep.subr.mxu0 %v3785_v4 }
 0x721   :  { %3717 = vmatpush3.msra.mxu0 %v3778_v6 }
 0x722   :  { %3718 = vmatprep.subr.mxu0 %v3785_v4 }
 0x723   :  { %3719 = vmatpush3.msra.mxu0 %v3779_v37 }
 0x724   :  { %3720 = vmatprep.subr.mxu0 %v3785_v4 }
 0x725   :  { %3721 = vmatpush3.msra.mxu0 %v3780_v38 }
 0x726   :  { %3722 = vmatprep.subr.mxu0 %v3785_v4 }
 0x727   :  { %3723 = vmatpush3.msra.mxu0 %v3781_v5 }
 0x728   :  { %3724 = vmatprep.subr.mxu0 %v3785_v4 }
 0x729   :  { %3725 = vmatpush3.msra.mxu0 %v3782_v39 }
 0x7da   :  { %v2740_v40 = vpop.f32.mrf.mxu0 }
 0x7db   :  { %v2744_v41 = vsel %vm197_vm1, %v2740_v40, -inf }
 0x7dc   :  { %2745 = vmax.xlane.f32.xlu1 %v2744_v41  ;;  %v3669_v42 = vpop.f32.mrf.mxu0 }
 0x865   :  { %v2746_v43 = vpop.xlane.xlu1 %2745 }
 0x866   :  { %v2747_v44 = vsub.f32 %v2740_v40, %v2746_v43 }
 0x868   :  { %v2748_v45 = vmul.f32 1.442695, %v2747_v44 }
 0x86a   :  { %3763 = vpow2.f32 %v2748_v45 }
 0x877   :  { %v3764_v46 = vpop.eup %3763 }
 0x878   :  { %v2750_v47 = vsel %vm197_vm1, %v3764_v46, 0.0 }
 0x879   :  { %2751 = vadd.xlane.f32.xlu0 %v2750_v47 }
 0x88f   :  { %100 = vperm.xlu0 %3761, %v46_v48  }
 0x893   :  { %3762 = vset.pattern.permute.xlu0 %v3792_v24  ;;  %v93_v24 = vld [vmem:[%s4534_s12 + $0x60] sm:$0xff] }
 0x902   :  { %v2752_v49 = vpop.xlane.xlu0 %2751 }
 0x903   :  { %3765 = vrcp.f32 %v2752_v49 }
 0x90a   :  { %v101_v3 = vpop.permute.xlu0 %100 }
 0x90b   :  { %vm102_vm8 = vcmp.eq.s32.totalorder %v101_v3, %v3951_v16  ;;  %v94_v16 = vld [vmem:[%s4534_s12 + $0x68] sm:$0xff] }
 0x90c   :  { %v3083_v9 = vsel %vm102_vm8, 1.0, %v3785_v4 }
 0x90d   :  { %3727 = vmatmul.mubr.msk.f32.vlgmr.msra.gmra.mxu0 %vm117_vm3, %v3083_v9 }
 0x910   :  { %v3766_v50 = vpop.eup %3765 }
 0x911   :  { %v2754_v7 = vmul.f32 %v3766_v50, %v3764_v46 }
 0x913   :  { %3673 = vmatmul.mubr.msk.f32.vlgmr.msra.gmra.mxu1 %vm197_vm1, %v2754_v7  ;;  %vm3077_vm1 = vcmask 15368  }
 0x914   :  { %3676 = vmatpush3.msra.mxu1 %v96_v8  ;;  %3707 = vmatprep.mubr.msk.f32.mxu1 %vm3786_vm0, %v3785_v4 }
 0x915   :  { %3677 = vmatprep.subr.mxu1 %v3785_v4 }
 0x916   :  { %3678 = vmatpush3.msra.mxu1 %v95_v10 }
 0x917   :  { %3679 = vmatprep.subr.mxu1 %v3785_v4 }
 0x918   :  { %3680 = vmatpush3.msra.mxu1 %v94_v16 }
 0x919   :  { %3681 = vmatprep.subr.mxu1 %v3785_v4 }
 0x91a   :  { %3682 = vmatpush3.msra.mxu1 %v93_v24 }
 0x91b   :  { %3683 = vmatprep.subr.mxu1 %v3785_v4 }
 0x91c   :  { %3684 = vmatpush3.msra.mxu1 %v92_v11 }
 0x91d   :  { %3685 = vmatprep.subr.mxu1 %v3785_v4 }
 0x91e   :  { %3686 = vmatpush3.msra.mxu1 %v91_v12 }
 0x91f   :  { %3687 = vmatprep.subr.mxu1 %v3785_v4 }
 0x920   :  { %3688 = vmatpush3.msra.mxu1 %v90_v13 }
 0x921   :  { %3689 = vmatprep.subr.mxu1 %v3785_v4 }
 0x922   :  { %3690 = vmatpush3.msra.mxu1 %v89_v25 }
 0x923   :  { %3691 = vmatprep.subr.mxu1 %v3785_v4 }
 0x924   :  { %3692 = vmatpush3.msra.mxu1 %v88_v51 }
 0x925   :  { %3693 = vmatprep.subr.mxu1 %v3785_v4 }
 0x926   :  { %3694 = vmatpush3.msra.mxu1 %v87_v52 }
 0x927   :  { %3695 = vmatprep.subr.mxu1 %v3785_v4 }
 0x928   :  { %3696 = vmatpush3.msra.mxu1 %v86_v53 }
 0x929   :  { %3697 = vmatprep.subr.mxu1 %v3785_v4 }
 0x92a   :  { %3698 = vmatpush3.msra.mxu1 %v85_v54 }
 0x92b   :  { %3699 = vmatprep.subr.mxu1 %v3785_v4 }
 0x92c   :  { %3700 = vmatpush3.msra.mxu1 %v84_v55 }
 0x92d   :  { %3701 = vmatprep.subr.mxu1 %v3785_v4 }
 0x92e   :  { %3702 = vmatpush3.msra.mxu1 %v83_v56 }
 0x92f   :  { %3703 = vmatprep.subr.mxu1 %v3785_v4 }
 0x930   :  { %3704 = vmatpush3.msra.mxu1 %v82_v57 }
 0x931   :  { %3705 = vmatprep.subr.mxu1 %v3785_v4 }
 0x932   :  { %3706 = vmatpush3.msra.mxu1 %v81_v58 }
 0x933   :  { %3729 = vmatprep.subr.mxu1 %v3785_v4 }
 0x9cd   :  { %v2968_v60 = vpop.f32.mrf.mxu0 }
 0x9cf   :  { %v3728_v63 = vpop.f32.mrf.mxu0 }
 0x9d3   :  { %v2824_v59 = vpop.f32.mrf.mxu1 }
 0x9d4   :  { %v2828_v61 = vmul.f32 %v2824_v59, %v4388_v23 }
 0x9d5   :  { %v3674_v62 = vpop.f32.mrf.mxu1 }
 0x9d6   :  { %3708 = vmatmul.mubr.f32.vlgmr.msra.gmra.mxu1 %v2828_v61 }
 0x9d7   :  { %3733 = vmatprep.mubr.msk.f32.mxu1 %vm3786_vm0, %v3785_v4  ;;  %3730 = vmatpush3.msra.mxu1 %v60_v0  ;;  %vm3071_vm0 = vcmask 7168  }
 0x9d8   :  { %3731 = vmatprep.subr.mxu1 %v3785_v4 }
 0x9d9   :  { %3732 = vmatpush3.msra.mxu1 %v59_v14 }
 0xa96   :  { %v2895_v15 = vpop.f32.mrf.mxu1 }
 0xa97   :  { %v2969_v29 = vadd.f32 %v2968_v60, %v2895_v15 }
 0xa98   :  { %v3709_v31 = vpop.f32.mrf.mxu1 }
 0xa99   :  { %3734 = vmatmul.mubr.msk.f32.vlgmr.msra.gmra.mxu1 %vm435_vm7, %v2969_v29 }
 0xb59   :  { %v3047_v19 = vpop.f32.mrf.mxu1 }
 0xb5a   :  { %v3048_v20 = vadd.f32 %v3135_v27, %v3047_v19 }
 0xb5b   :  { %v3735_v21 = vpop.f32.mrf.mxu1 }
 0xb5c   :  { %3767 = vtanh.f32 %v3048_v20 }
 0xb69   :  { %v3768_v22 = vpop.eup %3767 }
 0xb6a   :  { %v3052_v4 = vmul.f32 %v3768_v22, %v45_v18 }
 0xb6c   :  { %v3053_v23 = vsel %vm435_vm7, %v3052_v4, 0.0 }
 0xb6d   :  { %3054 = vadd.xlane.f32.xlu1 %v3053_v23 }
 0xbf6   :  { %v3055_v26 = vpop.xlane.xlu1 %3054 }
 0xbf7   :  { %v3056_v28 = vmul.f32 0.5, %v3055_v26  ;;  %v3063_v30 = vand.u32 2147483647, %v3055_v26  ;;  %v3060_v18 = vmax.f32 %v3055_v26, 0.0  ;;  %v3061_v6 = vmul.f32 %v3055_v26, %v49_v17 }
 0xbf9   :  { %3769 = vtanh.f32 %v3056_v28  ;;  %v3064_v32 = vsub.f32 0.0, %v3063_v30  ;;  %v3062_v38 = vsub.f32 %v3060_v18, %v3061_v6 }
 0xbfb   :  { %v3065_v33 = vmul.f32 1.442695, %v3064_v32 }
 0xbfd   :  { %3771 = vpow2.f32 %v3065_v33 }
 0xc06   :  { %v3770_v34 = vpop.eup %3769 }
 0xc07   :  { %v3058_v35 = vadd.f32 1.0, %v3770_v34 }
 0xc09   :  { %v3059_v36 = vmul.f32 0.5, %v3058_v35 }
 0xc0a   :  { %v3772_v1 = vpop.eup %3771 }
 0xc0b   :  { %v3067_v2 = vadd.f32 1.0, %v3772_v1  ;;  %3072 = vst.msk [vmem:[%s4537_s13] sm:$0xff] %vm3071_vm0, %v3059_v36 }
 0xc0d   :  { %3773 = vlog2.f32 %v3067_v2 }
 0xc1a   :  { %v3774_v37 = vpop.eup %3773 }
 0xc1b   :  { %v3069_v5 = vmul.f32 0.6931472, %v3774_v37 }
 0xc1d   :  { %v3070_v39 = vadd.f32 %v3069_v5, %v3062_v38 }
 0xc1f   :  { %3074 = vrot.lane.b32.xlu1 %v3070_v39, %s3793_s26 }
 0xc91   :  { %v3075_v40 = vpop.permute.xlu1 %3074 }
 0xc92   :  { %3078 = vst.msk [vmem:[%s4537_s13] sm:$0xff] %vm3077_vm1, %v3075_v40 }

</bundles_post_ra>
